<compile_context>
chip_gen: v7x
topology: tpu7x:2x2x1
jax: 0.10.0
libtpu: 0.0.40
codegen_flags: <defaults>
</compile_context>

<pallas_src>
import functools

import jax
import jax.numpy as jnp
import numpy as np
from jax.experimental import pallas as pl
from jax.experimental.pallas import tpu as pltpu

EPS = 1e-5
VMEM_LIMIT = 32 * 1024 * 1024


# --------------------------------------------------------------------------- #
# shared math helpers (used by both the kernel-pipeline glue and the reference)
# --------------------------------------------------------------------------- #
def _fold_bn(ssum, ssq, n, gamma, beta):
    """Fold training-mode BN (biased var) into per-channel scale/bias (f32)."""
    mean = ssum / n
    var = ssq / n - mean * mean
    scale = gamma * jax.lax.rsqrt(var + EPS)
    bias = beta - mean * scale
    return scale, bias


def _se_gate(pool_sum, L, scale3, bias3, se1, se2):
    """SE gate from the per-batch sum over L of the (pre-BN) conv3 output."""
    # mean over L of bn3(z3) == scale3 * mean_L(z3) + bias3   (bn3 is affine)
    se_in = (pool_sum / L) * scale3 + bias3                              # (B, C4)
    h = jnp.maximum(jnp.dot(se_in, se1, preferred_element_type=jnp.float32), 0.0)
    return jax.nn.sigmoid(jnp.dot(h, se2, preferred_element_type=jnp.float32))


def _pick_tile(L, cin, p, c4):
    """Largest 128-multiple L tile whose double-buffered blocks stay under budget."""
    assert L % 128 == 0, "L must be a multiple of 128"  # TODO(synk): ragged L
    # generous per-L-element byte estimate of the heaviest pass, x2 double-buffer
    per_row = 2 * (4 * cin + 2 * p + 2 * c4 + 2 * p + 2 * c4 + 4 * c4)
    tl = 128
    for t in (256, 512, 1024, 2048):
        if L % t == 0 and t * per_row <= 12 * 1024 * 1024:
            tl = t
    return tl


# --------------------------------------------------------------------------- #
# pass 1: fused conv1 + shortcut conv (one matmul), accumulate BN1/BNs stats
# --------------------------------------------------------------------------- #
def _k1_kernel(x_ref, wf_ref, h1_ref, sc_ref, st_ref):
    i = pl.program_id(1)

    @pl.when(i == 0)
    def _():
        st_ref[...] = jnp.zeros_like(st_ref)

    x = x_ref[0].astype(jnp.bfloat16)                                    # (Cin, TL)
    z1 = jnp.dot(wf_ref[...], x, preferred_element_type=jnp.float32)    # (P+C4, TL)

    P = h1_ref.shape[1]
    h1_ref[0] = z1[:P, :].astype(h1_ref.dtype)                           # raw conv1
    sc_ref[0] = z1[P:, :].astype(sc_ref.dtype)                           # raw shortcut

    tile_stats = jnp.concatenate(
        [jnp.sum(z1, axis=1, keepdims=True),
         jnp.sum(z1 * z1, axis=1, keepdims=True)], axis=1)               # (P+C4, 2)
    st_ref[0] = st_ref[0] + tile_stats


# --------------------------------------------------------------------------- #
# pass 2: folded BN1 + ReLU, depthwise k=3 (128-lane halo blocks), pointwise
#         conv, accumulate BN2 stats
# --------------------------------------------------------------------------- #
def _k2_kernel(hc_ref, hp_ref, hn_ref, s1_ref, c1_ref, wdw_ref, wpw_ref,
               z2_ref, st_ref):
    i = pl.program_id(1)
    nt = pl.num_programs(1)
    TL = hc_ref.shape[2]

    @pl.when(i == 0)
    def _():
        st_ref[...] = jnp.zeros_like(st_ref)

    s1 = s1_ref[...]                                                     # (P, 1)
    c1 = c1_ref[...]

    def bn_relu(v):
        return jnp.maximum(v.astype(jnp.float32) * s1 + c1, 0.0)

    h = bn_relu(hc_ref[0])                                               # (P, TL)
    # halo: only one (P, 128) block per neighbour is DMA'd; we use 1 column.
    prev_col = bn_relu(hp_ref[0][:, 127:128])                            # (P, 1)
    next_col = bn_relu(hn_ref[0][:, 0:1])                                # (P, 1)
    prev_col = jnp.where(i == 0, jnp.zeros_like(prev_col), prev_col)
    next_col = jnp.where(i == nt - 1, jnp.zeros_like(next_col), next_col)

    # shifted copies along lanes (pltpu.roll is an alternative XLU-only path)
    left = jnp.concatenate([prev_col, h[:, :TL - 1]], axis=1)            # h[l-1]
    right = jnp.concatenate([h[:, 1:], next_col], axis=1)                # h[l+1]

    w = wdw_ref[...]                                                     # (P, 3)
    dw = left * w[:, 0:1] + h * w[:, 1:2] + right * w[:, 2:3]

    z2 = jnp.dot(wpw_ref[...], dw.astype(jnp.bfloat16),
                 preferred_element_type=jnp.float32)                     # (P, TL)
    z2_ref[0] = z2.astype(z2_ref.dtype)

    tile_stats = jnp.concatenate(
        [jnp.sum(z2, axis=1, keepdims=True),
         jnp.sum(z2 * z2, axis=1, keepdims=True)], axis=1)               # (P, 2)
    st_ref[0] = st_ref[0] + tile_stats


# --------------------------------------------------------------------------- #
# pass 3: folded BN2 + ReLU, conv3 (expansion) -> ONLY the BN3/SE statistics
#         (z3 itself is recomputed in pass 4; no HBM round-trip)
# --------------------------------------------------------------------------- #
def _k3_kernel(z2_ref, s2_ref, c2_ref, w3_ref, st_ref):
    i = pl.program_id(1)

    @pl.when(i == 0)
    def _():
        st_ref[...] = jnp.zeros_like(st_ref)

    h = jnp.maximum(z2_ref[0].astype(jnp.float32) * s2_ref[...] + c2_ref[...], 0.0)
    z3 = jnp.dot(w3_ref[...], h.astype(jnp.bfloat16),
                 preferred_element_type=jnp.float32)                     # (C4, TL)
    tile_stats = jnp.concatenate(
        [jnp.sum(z3, axis=1, keepdims=True),
         jnp.sum(z3 * z3, axis=1, keepdims=True)], axis=1)               # (C4, 2)
    st_ref[0] = st_ref[0] + tile_stats


# --------------------------------------------------------------------------- #
# pass 4: recompute z3, folded BN3, SE scaling, folded shortcut BN, residual,
#         ReLU -> final (B, C4, L) output (already in PyTorch layout)
# --------------------------------------------------------------------------- #
def _k4_kernel(z2_ref, sc_ref, yse_ref, s2_ref, c2_ref, w3_ref,
               s3_ref, c3_ref, ss_ref, cs_ref, o_ref):
    h = jnp.maximum(z2_ref[0].astype(jnp.float32) * s2_ref[...] + c2_ref[...], 0.0)
    z3 = jnp.dot(w3_ref[...], h.astype(jnp.bfloat16),
                 preferred_element_type=jnp.float32)                     # (C4, TL)
    main = (z3 * s3_ref[...] + c3_ref[...]) * yse_ref[0]                 # * (C4, 1)
    short = sc_ref[0].astype(jnp.float32) * ss_ref[...] + cs_ref[...]
    o_ref[0] = jnp.maximum(main + short, 0.0).astype(o_ref.dtype)


# --------------------------------------------------------------------------- #
# wrapper: 4 pipelined pallas_calls + tiny scalar glue (BN folding, SE FCs)
# --------------------------------------------------------------------------- #
def bottleneck1d_pallas(x_ncl, params, tile_l=None, out_dtype=jnp.float32):
    """x_ncl: (B, Cin, L) PyTorch Conv1d layout. Returns (B, 4*planes, L)."""
    B, Cin, L = x_ncl.shape
    P = params["w1_t"].shape[0]
    C4 = params["w3_t"].shape[0]
    TL = _pick_tile(L, Cin, P, C4) if tile_l is None else tile_l
    assert L % TL == 0 and TL % 128 == 0
    NT = L // TL
    TLB = TL // 128                      # lane-blocks (of 128) per L tile
    LB = L // 128                        # lane-blocks total
    n = B * L
    f32, bf16 = jnp.float32, jnp.bfloat16

    wf_t = jnp.concatenate([params["w1_t"], params["ws_t"]], axis=0).astype(bf16)
    wpw_t = params["wpw_t"].astype(bf16)                                 # (P, P)
    w3_t = params["w3_t"].astype(bf16)                                   # (C4, P)
    wdw = params["wdw"].astype(f32)                                      # (P, 3)

    cparams_acc = pltpu.CompilerParams(
        dimension_semantics=("parallel", "arbitrary"), vmem_limit_bytes=VMEM_LIMIT)

    # ---- pass 1: fused conv1 + shortcut conv ---------------------------------
    h1, sc1, stats1 = pl.pallas_call(
        _k1_kernel,
        grid=(B, NT),
        in_specs=[
            pl.BlockSpec((1, Cin, TL), lambda b, i: (b, 0, i)),
            pl.BlockSpec((P + C4, Cin), lambda b, i: (0, 0)),
        ],
        out_shape=(
            jax.ShapeDtypeStruct((B, P, L), bf16),
            jax.ShapeDtypeStruct((B, C4, L), bf16),
            jax.ShapeDtypeStruct((B, P + C4, 2), f32),
        ),
        out_specs=(
            pl.BlockSpec((1, P, TL), lambda b, i: (b, 0, i)),
            pl.BlockSpec((1, C4, TL), lambda b, i: (b, 0, i)),
            pl.BlockSpec((1, P + C4, 2), lambda b, i: (b, 0, 0)),
        ),
        compiler_params=cparams_acc,
        cost_estimate=pl.CostEstimate(
            flops=2 * n * Cin * (P + C4), transcendentals=0,
            bytes_accessed=n * (4 * Cin + 2 * (P + C4))),
    )(x_ncl, wf_t)

    st1 = jnp.sum(stats1, axis=0)                                        # (P+C4, 2)
    s1, c1 = _fold_bn(st1[:P, 0], st1[:P, 1], n, params["g1"], params["b1"])
    ssc, csc = _fold_bn(st1[P:, 0], st1[P:, 1], n, params["gs"], params["bs"])
    s1c, c1c = s1.reshape(P, 1), c1.reshape(P, 1)
    sscc, cscc = ssc.reshape(C4, 1), csc.reshape(C4, 1)

    # ---- pass 2: BN1+ReLU, depthwise (lane halo blocks), pointwise -----------
    z2, stats2 = pl.pallas_call(
        _k2_kernel,
        grid=(B, NT),
        in_specs=[
            pl.BlockSpec((1, P, TL), lambda b, i: (b, 0, i)),
            pl.BlockSpec((1, P, 128),
                         lambda b, i: (b, 0, jnp.maximum(i * TLB - 1, 0))),
            pl.BlockSpec((1, P, 128),
                         lambda b, i: (b, 0, jnp.minimum((i + 1) * TLB, LB - 1))),
            pl.BlockSpec((P, 1), lambda b, i: (0, 0)),
            pl.BlockSpec((P, 1), lambda b, i: (0, 0)),
            pl.BlockSpec((P, 3), lambda b, i: (0, 0)),
            pl.BlockSpec((P, P), lambda b, i: (0, 0)),
        ],
        out_shape=(
            jax.ShapeDtypeStruct((B, P, L), bf16),
            jax.ShapeDtypeStruct((B, P, 2), f32),
        ),
        out_specs=(
            pl.BlockSpec((1, P, TL), lambda b, i: (b, 0, i)),
            pl.BlockSpec((1, P, 2), lambda b, i: (b, 0, 0)),
        ),
        compiler_params=cparams_acc,
        cost_estimate=pl.CostEstimate(
            flops=2 * n * P * P + 8 * n * P, transcendentals=0,
            bytes_accessed=4 * n * P),
    )(h1, h1, h1, s1c, c1c, wdw, wpw_t)

    st2 = jnp.sum(stats2, axis=0)                                        # (P, 2)
    s2, c2 = _fold_bn(st2[:, 0], st2[:, 1], n, params["g2"], params["b2"])
    s2c, c2c = s2.reshape(P, 1), c2.reshape(P, 1)

    # ---- pass 3: BN2+ReLU, conv3 -> stats only (no z3 writeback) -------------
    stats3 = pl.pallas_call(
        _k3_kernel,
        grid=(B, NT),
        in_specs=[
            pl.BlockSpec((1, P, TL), lambda b, i: (b, 0, i)),
            pl.BlockSpec((P, 1), lambda b, i: (0, 0)),
            pl.BlockSpec((P, 1), lambda b, i: (0, 0)),
            pl.BlockSpec((C4, P), lambda b, i: (0, 0)),
        ],
        out_shape=jax.ShapeDtypeStruct((B, C4, 2), f32),
        out_specs=pl.BlockSpec((1, C4, 2), lambda b, i: (b, 0, 0)),
        compiler_params=cparams_acc,
        cost_estimate=pl.CostEstimate(
            flops=2 * n * P * C4, transcendentals=0, bytes_accessed=2 * n * P),
    )(z2, s2c, c2c, w3_t)

    st3 = jnp.sum(stats3, axis=0)                                        # (C4, 2)
    s3, c3 = _fold_bn(st3[:, 0], st3[:, 1], n, params["g3"], params["b3"])
    # SE gate: per-batch pool sum is the first column of the bn3 stats accumulator
    y_se = _se_gate(stats3[:, :, 0], L, s3, c3, params["se1"], params["se2"])

    # ---- pass 4: recompute z3, BN3 + SE + shortcut BN + residual + ReLU ------
    out = pl.pallas_call(
        _k4_kernel,
        grid=(B, NT),
        in_specs=[
            pl.BlockSpec((1, P, TL), lambda b, i: (b, 0, i)),
            pl.BlockSpec((1, C4, TL), lambda b, i: (b, 0, i)),
            pl.BlockSpec((1, C4, 1), lambda b, i: (b, 0, 0)),
            pl.BlockSpec((P, 1), lambda b, i: (0, 0)),
            pl.BlockSpec((P, 1), lambda b, i: (0, 0)),
            pl.BlockSpec((C4, P), lambda b, i: (0, 0)),
            pl.BlockSpec((C4, 1), lambda b, i: (0, 0)),
            pl.BlockSpec((C4, 1), lambda b, i: (0, 0)),
            pl.BlockSpec((C4, 1), lambda b, i: (0, 0)),
            pl.BlockSpec((C4, 1), lambda b, i: (0, 0)),
        ],
        out_shape=jax.ShapeDtypeStruct((B, C4, L), out_dtype),
        out_specs=pl.BlockSpec((1, C4, TL), lambda b, i: (b, 0, i)),
        compiler_params=pltpu.CompilerParams(
            dimension_semantics=("parallel", "parallel"),
            vmem_limit_bytes=VMEM_LIMIT),
        cost_estimate=pl.CostEstimate(
            flops=2 * n * P * C4 + 8 * n * C4, transcendentals=0,
            bytes_accessed=n * (2 * P + 2 * C4) + n * C4 * jnp.dtype(out_dtype).itemsize),
    )(z2, sc1, y_se.reshape(B, C4, 1), s2c, c2c, w3_t,
      s3.reshape(C4, 1), c3.reshape(C4, 1), sscc, cscc)

    return out                                                            # (B, C4, L)


# --------------------------------------------------------------------------- #
# pure-JAX reference (identical math, incl. bf16 storage of intermediates)
# --------------------------------------------------------------------------- #
def _reference(x, params):
    f32, bf16 = jnp.float32, jnp.bfloat16
    B, Cin, L = x.shape
    P = params["w1_t"].shape[0]
    C4 = params["w3_t"].shape[0]
    n = B * L

    xb = x.astype(bf16)
    wf_t = jnp.concatenate([params["w1_t"], params["ws_t"]], axis=0).astype(bf16)
    z1 = jnp.einsum("oc,bcl->bol", wf_t, xb, preferred_element_type=f32)  # (B,P+C4,L)
    ssum1 = z1.sum(axis=(0, 2)); ssq1 = (z1 * z1).sum(axis=(0, 2))
    h1 = z1[:, :P].astype(bf16)
    sc1 = z1[:, P:].astype(bf16)
    s1, c1 = _fold_bn(ssum1[:P], ssq1[:P], n, params["g1"], params["b1"])
    ssc, csc = _fold_bn(ssum1[P:], ssq1[P:], n, params["gs"], params["bs"])

    h = jnp.maximum(h1.astype(f32) * s1[None, :, None] + c1[None, :, None], 0.0)
    zero = jnp.zeros((B, P, 1), f32)
    left = jnp.concatenate([zero, h[:, :, :-1]], axis=2)
    right = jnp.concatenate([h[:, :, 1:], zero], axis=2)
    wdw = params["wdw"]
    dw = (left * wdw[None, :, 0:1] + h * wdw[None, :, 1:2]
          + right * wdw[None, :, 2:3])
    z2 = jnp.einsum("oi,bil->bol", params["wpw_t"].astype(bf16), dw.astype(bf16),
                    preferred_element_type=f32)
    ssum2 = z2.sum(axis=(0, 2)); ssq2 = (z2 * z2).sum(axis=(0, 2))
    z2b = z2.astype(bf16)
    s2, c2 = _fold_bn(ssum2, ssq2, n, params["g2"], params["b2"])

    h2 = jnp.maximum(z2b.astype(f32) * s2[None, :, None] + c2[None, :, None], 0.0)
    z3 = jnp.einsum("oi,bil->bol", params["w3_t"].astype(bf16), h2.astype(bf16),
                    preferred_element_type=f32)                           # (B,C4,L)
    ssum3 = z3.sum(axis=(0, 2)); ssq3 = (z3 * z3).sum(axis=(0, 2))
    pool = z3.sum(axis=2)                                                 # (B, C4)
    s3, c3 = _fold_bn(ssum3, ssq3, n, params["g3"], params["b3"])
    y = _se_gate(pool, L, s3, c3, params["se1"], params["se2"])           # (B, C4)

    main = (z3 * s3[None, :, None] + c3[None, :, None]) * y[:, :, None]
    short = sc1.astype(f32) * ssc[None, :, None] + csc[None, :, None]
    return jnp.maximum(main + short, 0.0)


if __name__ == "__main__":
    # Bottleneck1D(in_planes=16, planes=8), stride=1, SE reduction=16
    B, in_planes, planes, L = 2, 16, 8, 512
    C4 = planes * 4                    # 32
    hidden = max(C4 // 16, 1)          # 2

    key = jax.random.PRNGKey(0)
    ks = jax.random.split(key, 12)

    def rnd(k, shape, s=0.1):
        return jax.random.normal(k, shape, jnp.float32) * s

    params = {
        # conv1: torch (planes, in_planes, 1) -> stored (planes, in_planes)
        "w1_t": rnd(ks[0], (planes, in_planes)),
        "g1": 1.0 + rnd(ks[8], (planes,)), "b1": rnd(ks[9], (planes,)),
        # depthwise: torch (planes, 1, 3) -> stored (planes, 3)
        "wdw": rnd(ks[1], (planes, 3)),
        # pointwise: torch (planes, planes, 1) -> stored (out, in) = (planes, planes)
        "wpw_t": rnd(ks[2], (planes, planes)),
        "g2": jnp.ones((planes,), jnp.float32), "b2": jnp.zeros((planes,), jnp.float32),
        # conv3: torch (C4, planes, 1) -> stored (C4, planes)
        "w3_t": rnd(ks[3], (C4, planes)),
        "g3": 1.0 + rnd(ks[10], (C4,)), "b3": rnd(ks[11], (C4,)),
        # SE Linear weights (no bias), stored transposed for x @ W
        "se1": rnd(ks[4], (C4, hidden)),
        "se2": rnd(ks[5], (hidden, C4)),
        # shortcut conv: torch (C4, in_planes, 1) -> stored (C4, in_planes)
        "ws_t": rnd(ks[6], (C4, in_planes)),
        "gs": jnp.ones((C4,), jnp.float32), "bs": jnp.zeros((C4,), jnp.float32),
    }

    x = jax.random.normal(ks[7], (B, in_planes, L), jnp.float32)

    # tile_l=128 -> 4 L-tiles per batch: exercises the lane halo, the per-batch
    # SE pool and the cross-tile BN stats accumulation.
    fn = jax.jit(functools.partial(bottleneck1d_pallas, tile_l=128))
    out = jax.block_until_ready(fn(x, params))

    ref = _reference(x, params)
    np.testing.assert_allclose(np.asarray(out), np.asarray(ref), rtol=5e-3, atol=5e-3)
    assert out.shape == (B, C4, L)

    print("KERNEL_OK")
</pallas_src>

<mosaic_0001>
module attributes {stable_mosaic.version = 11 : i64} {
  func.func @_k1_kernel(%arg0: i32, %arg1: i32, %arg2: memref<1x16x128xf32, #tpu.memory_space<vmem>>, %arg3: memref<40x16xbf16, #tpu.memory_space<vmem>>, %arg4: memref<1x8x128xbf16, #tpu.memory_space<vmem>>, %arg5: memref<1x32x128xbf16, #tpu.memory_space<vmem>>, %arg6: memref<1x40x2xf32, #tpu.memory_space<vmem>>) attributes {dimension_semantics = [#tpu.dimension_semantics<parallel>, #tpu.dimension_semantics<arbitrary>], iteration_bounds = array<i64: 2, 4>, scalar_prefetch = 0 : i64, scratch_operands = 0 : i64, tpu.core_type = #tpu.core_type<tc>, window_params = [{transform_indices = @transform_0, window_bounds = array<i64: 1, 16, 128>}, {pipeline_mode = #tpu.pipeline_mode<synchronous>, transform_indices = @transform_1, window_bounds = array<i64: 40, 16>}, {transform_indices = @transform_2, window_bounds = array<i64: 1, 8, 128>}, {transform_indices = @transform_3, window_bounds = array<i64: 1, 32, 128>}, {transform_indices = @transform_4, window_bounds = array<i64: 1, 40, 2>}]} {
    %c0_i32 = arith.constant 0 : i32
    %0 = arith.cmpi eq, %arg1, %c0_i32 : i32
    %1 = arith.extui %0 : i1 to i32
    %c0_i32_0 = arith.constant 0 : i32
    %2 = arith.cmpi ne, %1, %c0_i32_0 : i32
    scf.if %2 {
      %cst_19 = arith.constant 0.000000e+00 : f32
      %30 = vector.broadcast %cst_19 : f32 to vector<1x40x2xf32>
      %c0_20 = arith.constant 0 : index
      %c0_21 = arith.constant 0 : index
      %c0_22 = arith.constant 0 : index
      %31 = vector.load %arg6[%c0_20, %c0_21, %c0_22] : memref<1x40x2xf32, #tpu.memory_space<vmem>>, vector<1x40x2xf32>
      tpu.vector_store %arg6[%c0_20, %c0_21, %c0_22], %30 {strides = array<i32>} : memref<1x40x2xf32, #tpu.memory_space<vmem>>, vector<1x40x2xf32>,
    } else {
    }
    %c0 = arith.constant 0 : index
    %c0_1 = arith.constant 0 : index
    %c0_2 = arith.constant 0 : index
    %3 = vector.load %arg2[%c0, %c0_1, %c0_2] : memref<1x16x128xf32, #tpu.memory_space<vmem>>, vector<1x16x128xf32>
    %4 = vector.shape_cast %3 : vector<1x16x128xf32> to vector<16x128xf32>
    %5 = arith.truncf %4 : vector<16x128xf32> to vector<16x128xbf16>
    %c0_3 = arith.constant 0 : index
    %c0_4 = arith.constant 0 : index
    %6 = vector.load %arg3[%c0_3, %c0_4] : memref<40x16xbf16, #tpu.memory_space<vmem>>, vector<40x16xbf16>
    %cst = arith.constant dense<0.000000e+00> : vector<40x128xf32>
    %7 = tpu.matmul %6, %5, %cst {dimension_numbers = #tpu.dot_dimension_numbers<[1], [0], [0], [1], [0, 0, 1, 1], [], []>} : vector<40x16xbf16>, vector<16x128xbf16>, vector<40x128xf32> -> vector<40x128xf32>
    %8 = vector.extract_strided_slice %7 {offsets = [0, 0], sizes = [8, 128], strides = [1, 1]} : vector<40x128xf32> to vector<8x128xf32>
    %9 = arith.truncf %8 : vector<8x128xf32> to vector<8x128xbf16>
    %c0_5 = arith.constant 0 : index
    %c0_6 = arith.constant 0 : index
    %c0_7 = arith.constant 0 : index
    %10 = vector.load %arg4[%c0_5, %c0_6, %c0_7] : memref<1x8x128xbf16, #tpu.memory_space<vmem>>, vector<1x8x128xbf16>
    %11 = vector.shape_cast %10 : vector<1x8x128xbf16> to vector<8x128xbf16>
    %12 = vector.shape_cast %9 : vector<8x128xbf16> to vector<1x8x128xbf16>
    tpu.vector_store %arg4[%c0_5, %c0_6, %c0_7], %12 {strides = array<i32>} : memref<1x8x128xbf16, #tpu.memory_space<vmem>>, vector<1x8x128xbf16>,
    %13 = vector.extract_strided_slice %7 {offsets = [8, 0], sizes = [32, 128], strides = [1, 1]} : vector<40x128xf32> to vector<32x128xf32>
    %14 = arith.truncf %13 : vector<32x128xf32> to vector<32x128xbf16>
    %c0_8 = arith.constant 0 : index
    %c0_9 = arith.constant 0 : index
    %c0_10 = arith.constant 0 : index
    %15 = vector.load %arg5[%c0_8, %c0_9, %c0_10] : memref<1x32x128xbf16, #tpu.memory_space<vmem>>, vector<1x32x128xbf16>
    %16 = vector.shape_cast %15 : vector<1x32x128xbf16> to vector<32x128xbf16>
    %17 = vector.shape_cast %14 : vector<32x128xbf16> to vector<1x32x128xbf16>
    tpu.vector_store %arg5[%c0_8, %c0_9, %c0_10], %17 {strides = array<i32>} : memref<1x32x128xbf16, #tpu.memory_space<vmem>>, vector<1x32x128xbf16>,
    %cst_11 = arith.constant dense<0.000000e+00> : vector<40xf32>
    %18 = vector.multi_reduction <add>, %7, %cst_11 [1] : vector<40x128xf32> to vector<40xf32>
    %19 = vector.shape_cast %18 : vector<40xf32> to vector<40x1xf32>
    %20 = arith.mulf %7, %7 : vector<40x128xf32>
    %cst_12 = arith.constant dense<0.000000e+00> : vector<40xf32>
    %21 = vector.multi_reduction <add>, %20, %cst_12 [1] : vector<40x128xf32> to vector<40xf32>
    %22 = vector.shape_cast %21 : vector<40xf32> to vector<40x1xf32>
    %23 = tpu.concatenate %19, %22 in 1 : vector<40x1xf32>, vector<40x1xf32> -> vector<40x2xf32>
    %c0_13 = arith.constant 0 : index
    %c0_14 = arith.constant 0 : index
    %c0_15 = arith.constant 0 : index
    %24 = vector.load %arg6[%c0_13, %c0_14, %c0_15] : memref<1x40x2xf32, #tpu.memory_space<vmem>>, vector<1x40x2xf32>
    %25 = vector.shape_cast %24 : vector<1x40x2xf32> to vector<40x2xf32>
    %26 = arith.addf %25, %23 : vector<40x2xf32>
    %c0_16 = arith.constant 0 : index
    %c0_17 = arith.constant 0 : index
    %c0_18 = arith.constant 0 : index
    %27 = vector.load %arg6[%c0_16, %c0_17, %c0_18] : memref<1x40x2xf32, #tpu.memory_space<vmem>>, vector<1x40x2xf32>
    %28 = vector.shape_cast %27 : vector<1x40x2xf32> to vector<40x2xf32>
    %29 = vector.shape_cast %26 : vector<40x2xf32> to vector<1x40x2xf32>
    tpu.vector_store %arg6[%c0_16, %c0_17, %c0_18], %29 {strides = array<i32>} : memref<1x40x2xf32, #tpu.memory_space<vmem>>, vector<1x40x2xf32>,
    return
  }
  func.func @transform_0(%arg0: i32, %arg1: i32) -> (i32, i32, i32) {
    %c0_i32 = arith.constant 0 : i32
    %c0_i32_0 = arith.constant 0 : i32
    return %arg0, %c0_i32, %arg1 : i32, i32, i32
  }
  func.func @transform_1(%arg0: i32, %arg1: i32) -> (i32, i32) {
    %c0_i32 = arith.constant 0 : i32
    %c0_i32_0 = arith.constant 0 : i32
    %c0_i32_1 = arith.constant 0 : i32
    return %c0_i32, %c0_i32_0 : i32, i32
  }
  func.func @transform_2(%arg0: i32, %arg1: i32) -> (i32, i32, i32) {
    %c0_i32 = arith.constant 0 : i32
    %c0_i32_0 = arith.constant 0 : i32
    return %arg0, %c0_i32, %arg1 : i32, i32, i32
  }
  func.func @transform_3(%arg0: i32, %arg1: i32) -> (i32, i32, i32) {
    %c0_i32 = arith.constant 0 : i32
    %c0_i32_0 = arith.constant 0 : i32
    return %arg0, %c0_i32, %arg1 : i32, i32, i32
  }
  func.func @transform_4(%arg0: i32, %arg1: i32) -> (i32, i32, i32) {
    %c0_i32 = arith.constant 0 : i32
    %c0_i32_0 = arith.constant 0 : i32
    %c0_i32_1 = arith.constant 0 : i32
    return %arg0, %c0_i32, %c0_i32_0 : i32, i32, i32
  }
}

module attributes {stable_mosaic.version = 11 : i64} {
  func.func @_k2_kernel(%arg0: i32, %arg1: i32, %arg2: memref<1x8x128xbf16, #tpu.memory_space<vmem>>, %arg3: memref<1x8x128xbf16, #tpu.memory_space<vmem>>, %arg4: memref<1x8x128xbf16, #tpu.memory_space<vmem>>, %arg5: memref<8x1xf32, #tpu.memory_space<vmem>>, %arg6: memref<8x1xf32, #tpu.memory_space<vmem>>, %arg7: memref<8x3xf32, #tpu.memory_space<vmem>>, %arg8: memref<8x8xbf16, #tpu.memory_space<vmem>>, %arg9: memref<1x8x128xbf16, #tpu.memory_space<vmem>>, %arg10: memref<1x8x2xf32, #tpu.memory_space<vmem>>) attributes {dimension_semantics = [#tpu.dimension_semantics<parallel>, #tpu.dimension_semantics<arbitrary>], iteration_bounds = array<i64: 2, 4>, scalar_prefetch = 0 : i64, scratch_operands = 0 : i64, tpu.core_type = #tpu.core_type<tc>, window_params = [{transform_indices = @transform_0, window_bounds = array<i64: 1, 8, 128>}, {transform_indices = @transform_1, window_bounds = array<i64: 1, 8, 128>}, {transform_indices = @transform_2, window_bounds = array<i64: 1, 8, 128>}, {pipeline_mode = #tpu.pipeline_mode<synchronous>, transform_indices = @transform_3, window_bounds = array<i64: 8, 1>}, {pipeline_mode = #tpu.pipeline_mode<synchronous>, transform_indices = @transform_4, window_bounds = array<i64: 8, 1>}, {pipeline_mode = #tpu.pipeline_mode<synchronous>, transform_indices = @transform_5, window_bounds = array<i64: 8, 3>}, {pipeline_mode = #tpu.pipeline_mode<synchronous>, transform_indices = @transform_6, window_bounds = array<i64: 8, 8>}, {transform_indices = @transform_7, window_bounds = array<i64: 1, 8, 128>}, {transform_indices = @transform_8, window_bounds = array<i64: 1, 8, 2>}]} {
    %c0_i32 = arith.constant 0 : i32
    %0 = arith.cmpi eq, %arg1, %c0_i32 : i32
    %1 = arith.extui %0 : i1 to i32
    %c0_i32_0 = arith.constant 0 : i32
    %2 = arith.cmpi ne, %1, %c0_i32_0 : i32
    scf.if %2 {
      %cst_34 = arith.constant 0.000000e+00 : f32
      %71 = vector.broadcast %cst_34 : f32 to vector<1x8x2xf32>
      %c0_35 = arith.constant 0 : index
      %c0_36 = arith.constant 0 : index
      %c0_37 = arith.constant 0 : index
      %72 = vector.load %arg10[%c0_35, %c0_36, %c0_37] : memref<1x8x2xf32, #tpu.memory_space<vmem>>, vector<1x8x2xf32>
      tpu.vector_store %arg10[%c0_35, %c0_36, %c0_37], %71 {strides = array<i32>} : memref<1x8x2xf32, #tpu.memory_space<vmem>>, vector<1x8x2xf32>,
    } else {
    }
    %c0 = arith.constant 0 : index
    %c0_1 = arith.constant 0 : index
    %3 = vector.load %arg5[%c0, %c0_1] : memref<8x1xf32, #tpu.memory_space<vmem>>, vector<8x1xf32>
    %c0_2 = arith.constant 0 : index
    %c0_3 = arith.constant 0 : index
    %4 = vector.load %arg6[%c0_2, %c0_3] : memref<8x1xf32, #tpu.memory_space<vmem>>, vector<8x1xf32>
    %c0_4 = arith.constant 0 : index
    %c0_5 = arith.constant 0 : index
    %c0_6 = arith.constant 0 : index
    %5 = vector.load %arg2[%c0_4, %c0_5, %c0_6] : memref<1x8x128xbf16, #tpu.memory_space<vmem>>, vector<1x8x128xbf16>
    %6 = vector.shape_cast %5 : vector<1x8x128xbf16> to vector<8x128xbf16>
    %7 = arith.extf %6 : vector<8x128xbf16> to vector<8x128xf32>
    %8 = vector.broadcast %3 : vector<8x1xf32> to vector<8x128xf32>
    %9 = arith.mulf %7, %8 : vector<8x128xf32>
    %10 = vector.broadcast %4 : vector<8x1xf32> to vector<8x128xf32>
    %11 = arith.addf %9, %10 : vector<8x128xf32>
    %cst = arith.constant 0.000000e+00 : f32
    %12 = vector.broadcast %cst : f32 to vector<8x128xf32>
    %13 = arith.maximumf %11, %12 : vector<8x128xf32>
    %c0_7 = arith.constant 0 : index
    %c0_8 = arith.constant 0 : index
    %c0_9 = arith.constant 0 : index
    %14 = vector.load %arg3[%c0_7, %c0_8, %c0_9] : memref<1x8x128xbf16, #tpu.memory_space<vmem>>, vector<1x8x128xbf16>
    %15 = vector.shape_cast %14 : vector<1x8x128xbf16> to vector<8x128xbf16>
    %16 = vector.extract_strided_slice %15 {offsets = [0, 127], sizes = [8, 1], strides = [1, 1]} : vector<8x128xbf16> to vector<8x1xbf16>
    %17 = arith.extf %16 : vector<8x1xbf16> to vector<8x1xf32>
    %18 = arith.mulf %17, %3 : vector<8x1xf32>
    %19 = arith.addf %18, %4 : vector<8x1xf32>
    %cst_10 = arith.constant 0.000000e+00 : f32
    %20 = vector.broadcast %cst_10 : f32 to vector<8x1xf32>
    %21 = arith.maximumf %19, %20 : vector<8x1xf32>
    %c0_11 = arith.constant 0 : index
    %c0_12 = arith.constant 0 : index
    %c0_13 = arith.constant 0 : index
    %22 = vector.load %arg4[%c0_11, %c0_12, %c0_13] : memref<1x8x128xbf16, #tpu.memory_space<vmem>>, vector<1x8x128xbf16>
    %23 = vector.shape_cast %22 : vector<1x8x128xbf16> to vector<8x128xbf16>
    %24 = vector.extract_strided_slice %23 {offsets = [0, 0], sizes = [8, 1], strides = [1, 1]} : vector<8x128xbf16> to vector<8x1xbf16>
    %25 = arith.extf %24 : vector<8x1xbf16> to vector<8x1xf32>
    %26 = arith.mulf %25, %3 : vector<8x1xf32>
    %27 = arith.addf %26, %4 : vector<8x1xf32>
    %cst_14 = arith.constant 0.000000e+00 : f32
    %28 = vector.broadcast %cst_14 : f32 to vector<8x1xf32>
    %29 = arith.maximumf %27, %28 : vector<8x1xf32>
    %c0_i32_15 = arith.constant 0 : i32
    %30 = arith.cmpi eq, %arg1, %c0_i32_15 : i32
    %cst_16 = arith.constant 0.000000e+00 : f32
    %31 = vector.broadcast %cst_16 : f32 to vector<8x1xf32>
    %32 = arith.select %30, %31, %21 : vector<8x1xf32>
    %c3_i32 = arith.constant 3 : i32
    %33 = arith.cmpi eq, %arg1, %c3_i32 : i32
    %cst_17 = arith.constant 0.000000e+00 : f32
    %34 = vector.broadcast %cst_17 : f32 to vector<8x1xf32>
    %35 = arith.select %33, %34, %29 : vector<8x1xf32>
    %36 = vector.extract_strided_slice %13 {offsets = [0, 0], sizes = [8, 127], strides = [1, 1]} : vector<8x128xf32> to vector<8x127xf32>
    %37 = tpu.concatenate %32, %36 in 1 : vector<8x1xf32>, vector<8x127xf32> -> vector<8x128xf32>
    %38 = vector.extract_strided_slice %13 {offsets = [0, 1], sizes = [8, 127], strides = [1, 1]} : vector<8x128xf32> to vector<8x127xf32>
    %39 = tpu.concatenate %38, %35 in 1 : vector<8x127xf32>, vector<8x1xf32> -> vector<8x128xf32>
    %c0_18 = arith.constant 0 : index
    %c0_19 = arith.constant 0 : index
    %40 = vector.load %arg7[%c0_18, %c0_19] : memref<8x3xf32, #tpu.memory_space<vmem>>, vector<8x3xf32>
    %41 = vector.extract_strided_slice %40 {offsets = [0, 0], sizes = [8, 1], strides = [1, 1]} : vector<8x3xf32> to vector<8x1xf32>
    %42 = vector.broadcast %41 : vector<8x1xf32> to vector<8x128xf32>
    %43 = arith.mulf %37, %42 : vector<8x128xf32>
    %44 = vector.extract_strided_slice %40 {offsets = [0, 1], sizes = [8, 1], strides = [1, 1]} : vector<8x3xf32> to vector<8x1xf32>
    %45 = vector.broadcast %44 : vector<8x1xf32> to vector<8x128xf32>
    %46 = arith.mulf %13, %45 : vector<8x128xf32>
    %47 = arith.addf %43, %46 : vector<8x128xf32>
    %48 = vector.extract_strided_slice %40 {offsets = [0, 2], sizes = [8, 1], strides = [1, 1]} : vector<8x3xf32> to vector<8x1xf32>
    %49 = vector.broadcast %48 : vector<8x1xf32> to vector<8x128xf32>
    %50 = arith.mulf %39, %49 : vector<8x128xf32>
    %51 = arith.addf %47, %50 : vector<8x128xf32>
    %c0_20 = arith.constant 0 : index
    %c0_21 = arith.constant 0 : index
    %52 = vector.load %arg8[%c0_20, %c0_21] : memref<8x8xbf16, #tpu.memory_space<vmem>>, vector<8x8xbf16>
    %53 = arith.truncf %51 : vector<8x128xf32> to vector<8x128xbf16>
    %cst_22 = arith.constant dense<0.000000e+00> : vector<8x128xf32>
    %54 = tpu.matmul %52, %53, %cst_22 {dimension_numbers = #tpu.dot_dimension_numbers<[1], [0], [0], [1], [0, 0, 1, 1], [], []>} : vector<8x8xbf16>, vector<8x128xbf16>, vector<8x128xf32> -> vector<8x128xf32>
    %55 = arith.truncf %54 : vector<8x128xf32> to vector<8x128xbf16>
    %c0_23 = arith.constant 0 : index
    %c0_24 = arith.constant 0 : index
    %c0_25 = arith.constant 0 : index
    %56 = vector.load %arg9[%c0_23, %c0_24, %c0_25] : memref<1x8x128xbf16, #tpu.memory_space<vmem>>, vector<1x8x128xbf16>
    %57 = vector.shape_cast %56 : vector<1x8x128xbf16> to vector<8x128xbf16>
    %58 = vector.shape_cast %55 : vector<8x128xbf16> to vector<1x8x128xbf16>
    tpu.vector_store %arg9[%c0_23, %c0_24, %c0_25], %58 {strides = array<i32>} : memref<1x8x128xbf16, #tpu.memory_space<vmem>>, vector<1x8x128xbf16>,
    %cst_26 = arith.constant dense<0.000000e+00> : vector<8xf32>
    %59 = vector.multi_reduction <add>, %54, %cst_26 [1] : vector<8x128xf32> to vector<8xf32>
    %60 = vector.shape_cast %59 : vector<8xf32> to vector<8x1xf32>
    %61 = arith.mulf %54, %54 : vector<8x128xf32>
    %cst_27 = arith.constant dense<0.000000e+00> : vector<8xf32>
    %62 = vector.multi_reduction <add>, %61, %cst_27 [1] : vector<8x128xf32> to vector<8xf32>
    %63 = vector.shape_cast %62 : vector<8xf32> to vector<8x1xf32>
    %64 = tpu.concatenate %60, %63 in 1 : vector<8x1xf32>, vector<8x1xf32> -> vector<8x2xf32>
    %c0_28 = arith.constant 0 : index
    %c0_29 = arith.constant 0 : index
    %c0_30 = arith.constant 0 : index
    %65 = vector.load %arg10[%c0_28, %c0_29, %c0_30] : memref<1x8x2xf32, #tpu.memory_space<vmem>>, vector<1x8x2xf32>
    %66 = vector.shape_cast %65 : vector<1x8x2xf32> to vector<8x2xf32>
    %67 = arith.addf %66, %64 : vector<8x2xf32>
    %c0_31 = arith.constant 0 : index
    %c0_32 = arith.constant 0 : index
    %c0_33 = arith.constant 0 : index
    %68 = vector.load %arg10[%c0_31, %c0_32, %c0_33] : memref<1x8x2xf32, #tpu.memory_space<vmem>>, vector<1x8x2xf32>
    %69 = vector.shape_cast %68 : vector<1x8x2xf32> to vector<8x2xf32>
    %70 = vector.shape_cast %67 : vector<8x2xf32> to vector<1x8x2xf32>
    tpu.vector_store %arg10[%c0_31, %c0_32, %c0_33], %70 {strides = array<i32>} : memref<1x8x2xf32, #tpu.memory_space<vmem>>, vector<1x8x2xf32>,
    return
  }
  func.func @transform_0(%arg0: i32, %arg1: i32) -> (i32, i32, i32) {
    %c0_i32 = arith.constant 0 : i32
    %c0_i32_0 = arith.constant 0 : i32
    return %arg0, %c0_i32, %arg1 : i32, i32, i32
  }
  func.func @transform_1(%arg0: i32, %arg1: i32) -> (i32, i32, i32) {
    %c1_i32 = arith.constant 1 : i32
    %0 = arith.muli %arg1, %c1_i32 : i32
    %c1_i32_0 = arith.constant 1 : i32
    %1 = arith.subi %0, %c1_i32_0 : i32
    %c0_i32 = arith.constant 0 : i32
    %2 = arith.maxsi %1, %c0_i32 : i32
    %c0_i32_1 = arith.constant 0 : i32
    %c0_i32_2 = arith.constant 0 : i32
    return %arg0, %c0_i32_1, %2 : i32, i32, i32
  }
  func.func @transform_2(%arg0: i32, %arg1: i32) -> (i32, i32, i32) {
    %c1_i32 = arith.constant 1 : i32
    %0 = arith.addi %arg1, %c1_i32 : i32
    %c1_i32_0 = arith.constant 1 : i32
    %1 = arith.muli %0, %c1_i32_0 : i32
    %c3_i32 = arith.constant 3 : i32
    %2 = arith.minsi %1, %c3_i32 : i32
    %c0_i32 = arith.constant 0 : i32
    %c0_i32_1 = arith.constant 0 : i32
    return %arg0, %c0_i32, %2 : i32, i32, i32
  }
  func.func @transform_3(%arg0: i32, %arg1: i32) -> (i32, i32) {
    %c0_i32 = arith.constant 0 : i32
    %c0_i32_0 = arith.constant 0 : i32
    %c0_i32_1 = arith.constant 0 : i32
    return %c0_i32, %c0_i32_0 : i32, i32
  }
  func.func @transform_4(%arg0: i32, %arg1: i32) -> (i32, i32) {
    %c0_i32 = arith.constant 0 : i32
    %c0_i32_0 = arith.constant 0 : i32
    %c0_i32_1 = arith.constant 0 : i32
    return %c0_i32, %c0_i32_0 : i32, i32
  }
  func.func @transform_5(%arg0: i32, %arg1: i32) -> (i32, i32) {
    %c0_i32 = arith.constant 0 : i32
    %c0_i32_0 = arith.constant 0 : i32
    %c0_i32_1 = arith.constant 0 : i32
    return %c0_i32, %c0_i32_0 : i32, i32
  }
  func.func @transform_6(%arg0: i32, %arg1: i32) -> (i32, i32) {
    %c0_i32 = arith.constant 0 : i32
    %c0_i32_0 = arith.constant 0 : i32
    %c0_i32_1 = arith.constant 0 : i32
    return %c0_i32, %c0_i32_0 : i32, i32
  }
  func.func @transform_7(%arg0: i32, %arg1: i32) -> (i32, i32, i32) {
    %c0_i32 = arith.constant 0 : i32
    %c0_i32_0 = arith.constant 0 : i32
    return %arg0, %c0_i32, %arg1 : i32, i32, i32
  }
  func.func @transform_8(%arg0: i32, %arg1: i32) -> (i32, i32, i32) {
    %c0_i32 = arith.constant 0 : i32
    %c0_i32_0 = arith.constant 0 : i32
    %c0_i32_1 = arith.constant 0 : i32
    return %arg0, %c0_i32, %c0_i32_0 : i32, i32, i32
  }
}

module attributes {stable_mosaic.version = 11 : i64} {
  func.func @_k3_kernel(%arg0: i32, %arg1: i32, %arg2: memref<1x8x128xbf16, #tpu.memory_space<vmem>>, %arg3: memref<8x1xf32, #tpu.memory_space<vmem>>, %arg4: memref<8x1xf32, #tpu.memory_space<vmem>>, %arg5: memref<32x8xbf16, #tpu.memory_space<vmem>>, %arg6: memref<1x32x2xf32, #tpu.memory_space<vmem>>) attributes {dimension_semantics = [#tpu.dimension_semantics<parallel>, #tpu.dimension_semantics<arbitrary>], iteration_bounds = array<i64: 2, 4>, scalar_prefetch = 0 : i64, scratch_operands = 0 : i64, tpu.core_type = #tpu.core_type<tc>, window_params = [{transform_indices = @transform_0, window_bounds = array<i64: 1, 8, 128>}, {pipeline_mode = #tpu.pipeline_mode<synchronous>, transform_indices = @transform_1, window_bounds = array<i64: 8, 1>}, {pipeline_mode = #tpu.pipeline_mode<synchronous>, transform_indices = @transform_2, window_bounds = array<i64: 8, 1>}, {pipeline_mode = #tpu.pipeline_mode<synchronous>, transform_indices = @transform_3, window_bounds = array<i64: 32, 8>}, {transform_indices = @transform_4, window_bounds = array<i64: 1, 32, 2>}]} {
    %c0_i32 = arith.constant 0 : i32
    %0 = arith.cmpi eq, %arg1, %c0_i32 : i32
    %1 = arith.extui %0 : i1 to i32
    %c0_i32_0 = arith.constant 0 : i32
    %2 = arith.cmpi ne, %1, %c0_i32_0 : i32
    scf.if %2 {
      %cst_18 = arith.constant 0.000000e+00 : f32
      %29 = vector.broadcast %cst_18 : f32 to vector<1x32x2xf32>
      %c0_19 = arith.constant 0 : index
      %c0_20 = arith.constant 0 : index
      %c0_21 = arith.constant 0 : index
      %30 = vector.load %arg6[%c0_19, %c0_20, %c0_21] : memref<1x32x2xf32, #tpu.memory_space<vmem>>, vector<1x32x2xf32>
      tpu.vector_store %arg6[%c0_19, %c0_20, %c0_21], %29 {strides = array<i32>} : memref<1x32x2xf32, #tpu.memory_space<vmem>>, vector<1x32x2xf32>,
    } else {
    }
    %c0 = arith.constant 0 : index
    %c0_1 = arith.constant 0 : index
    %c0_2 = arith.constant 0 : index
    %3 = vector.load %arg2[%c0, %c0_1, %c0_2] : memref<1x8x128xbf16, #tpu.memory_space<vmem>>, vector<1x8x128xbf16>
    %4 = vector.shape_cast %3 : vector<1x8x128xbf16> to vector<8x128xbf16>
    %5 = arith.extf %4 : vector<8x128xbf16> to vector<8x128xf32>
    %c0_3 = arith.constant 0 : index
    %c0_4 = arith.constant 0 : index
    %6 = vector.load %arg3[%c0_3, %c0_4] : memref<8x1xf32, #tpu.memory_space<vmem>>, vector<8x1xf32>
    %7 = vector.broadcast %6 : vector<8x1xf32> to vector<8x128xf32>
    %8 = arith.mulf %5, %7 : vector<8x128xf32>
    %c0_5 = arith.constant 0 : index
    %c0_6 = arith.constant 0 : index
    %9 = vector.load %arg4[%c0_5, %c0_6] : memref<8x1xf32, #tpu.memory_space<vmem>>, vector<8x1xf32>
    %10 = vector.broadcast %9 : vector<8x1xf32> to vector<8x128xf32>
    %11 = arith.addf %8, %10 : vector<8x128xf32>
    %cst = arith.constant 0.000000e+00 : f32
    %12 = vector.broadcast %cst : f32 to vector<8x128xf32>
    %13 = arith.maximumf %11, %12 : vector<8x128xf32>
    %c0_7 = arith.constant 0 : index
    %c0_8 = arith.constant 0 : index
    %14 = vector.load %arg5[%c0_7, %c0_8] : memref<32x8xbf16, #tpu.memory_space<vmem>>, vector<32x8xbf16>
    %15 = arith.truncf %13 : vector<8x128xf32> to vector<8x128xbf16>
    %cst_9 = arith.constant dense<0.000000e+00> : vector<32x128xf32>
    %16 = tpu.matmul %14, %15, %cst_9 {dimension_numbers = #tpu.dot_dimension_numbers<[1], [0], [0], [1], [0, 0, 1, 1], [], []>} : vector<32x8xbf16>, vector<8x128xbf16>, vector<32x128xf32> -> vector<32x128xf32>
    %cst_10 = arith.constant dense<0.000000e+00> : vector<32xf32>
    %17 = vector.multi_reduction <add>, %16, %cst_10 [1] : vector<32x128xf32> to vector<32xf32>
    %18 = vector.shape_cast %17 : vector<32xf32> to vector<32x1xf32>
    %19 = arith.mulf %16, %16 : vector<32x128xf32>
    %cst_11 = arith.constant dense<0.000000e+00> : vector<32xf32>
    %20 = vector.multi_reduction <add>, %19, %cst_11 [1] : vector<32x128xf32> to vector<32xf32>
    %21 = vector.shape_cast %20 : vector<32xf32> to vector<32x1xf32>
    %22 = tpu.concatenate %18, %21 in 1 : vector<32x1xf32>, vector<32x1xf32> -> vector<32x2xf32>
    %c0_12 = arith.constant 0 : index
    %c0_13 = arith.constant 0 : index
    %c0_14 = arith.constant 0 : index
    %23 = vector.load %arg6[%c0_12, %c0_13, %c0_14] : memref<1x32x2xf32, #tpu.memory_space<vmem>>, vector<1x32x2xf32>
    %24 = vector.shape_cast %23 : vector<1x32x2xf32> to vector<32x2xf32>
    %25 = arith.addf %24, %22 : vector<32x2xf32>
    %c0_15 = arith.constant 0 : index
    %c0_16 = arith.constant 0 : index
    %c0_17 = arith.constant 0 : index
    %26 = vector.load %arg6[%c0_15, %c0_16, %c0_17] : memref<1x32x2xf32, #tpu.memory_space<vmem>>, vector<1x32x2xf32>
    %27 = vector.shape_cast %26 : vector<1x32x2xf32> to vector<32x2xf32>
    %28 = vector.shape_cast %25 : vector<32x2xf32> to vector<1x32x2xf32>
    tpu.vector_store %arg6[%c0_15, %c0_16, %c0_17], %28 {strides = array<i32>} : memref<1x32x2xf32, #tpu.memory_space<vmem>>, vector<1x32x2xf32>,
    return
  }
  func.func @transform_0(%arg0: i32, %arg1: i32) -> (i32, i32, i32) {
    %c0_i32 = arith.constant 0 : i32
    %c0_i32_0 = arith.constant 0 : i32
    return %arg0, %c0_i32, %arg1 : i32, i32, i32
  }
  func.func @transform_1(%arg0: i32, %arg1: i32) -> (i32, i32) {
    %c0_i32 = arith.constant 0 : i32
    %c0_i32_0 = arith.constant 0 : i32
    %c0_i32_1 = arith.constant 0 : i32
    return %c0_i32, %c0_i32_0 : i32, i32
  }
  func.func @transform_2(%arg0: i32, %arg1: i32) -> (i32, i32) {
    %c0_i32 = arith.constant 0 : i32
    %c0_i32_0 = arith.constant 0 : i32
    %c0_i32_1 = arith.constant 0 : i32
    return %c0_i32, %c0_i32_0 : i32, i32
  }
  func.func @transform_3(%arg0: i32, %arg1: i32) -> (i32, i32) {
    %c0_i32 = arith.constant 0 : i32
    %c0_i32_0 = arith.constant 0 : i32
    %c0_i32_1 = arith.constant 0 : i32
    return %c0_i32, %c0_i32_0 : i32, i32
  }
  func.func @transform_4(%arg0: i32, %arg1: i32) -> (i32, i32, i32) {
    %c0_i32 = arith.constant 0 : i32
    %c0_i32_0 = arith.constant 0 : i32
    %c0_i32_1 = arith.constant 0 : i32
    return %arg0, %c0_i32, %c0_i32_0 : i32, i32, i32
  }
}

module attributes {stable_mosaic.version = 11 : i64} {
  func.func @_k4_kernel(%arg0: i32, %arg1: i32, %arg2: memref<1x8x128xbf16, #tpu.memory_space<vmem>>, %arg3: memref<1x32x128xbf16, #tpu.memory_space<vmem>>, %arg4: memref<1x32x1xf32, #tpu.memory_space<vmem>>, %arg5: memref<8x1xf32, #tpu.memory_space<vmem>>, %arg6: memref<8x1xf32, #tpu.memory_space<vmem>>, %arg7: memref<32x8xbf16, #tpu.memory_space<vmem>>, %arg8: memref<32x1xf32, #tpu.memory_space<vmem>>, %arg9: memref<32x1xf32, #tpu.memory_space<vmem>>, %arg10: memref<32x1xf32, #tpu.memory_space<vmem>>, %arg11: memref<32x1xf32, #tpu.memory_space<vmem>>, %arg12: memref<1x32x128xf32, #tpu.memory_space<vmem>>) attributes {dimension_semantics = [#tpu.dimension_semantics<parallel>, #tpu.dimension_semantics<parallel>], iteration_bounds = array<i64: 2, 4>, scalar_prefetch = 0 : i64, scratch_operands = 0 : i64, tpu.core_type = #tpu.core_type<tc>, window_params = [{transform_indices = @transform_0, window_bounds = array<i64: 1, 8, 128>}, {transform_indices = @transform_1, window_bounds = array<i64: 1, 32, 128>}, {transform_indices = @transform_2, window_bounds = array<i64: 1, 32, 1>}, {pipeline_mode = #tpu.pipeline_mode<synchronous>, transform_indices = @transform_3, window_bounds = array<i64: 8, 1>}, {pipeline_mode = #tpu.pipeline_mode<synchronous>, transform_indices = @transform_4, window_bounds = array<i64: 8, 1>}, {pipeline_mode = #tpu.pipeline_mode<synchronous>, transform_indices = @transform_5, window_bounds = array<i64: 32, 8>}, {pipeline_mode = #tpu.pipeline_mode<synchronous>, transform_indices = @transform_6, window_bounds = array<i64: 32, 1>}, {pipeline_mode = #tpu.pipeline_mode<synchronous>, transform_indices = @transform_7, window_bounds = array<i64: 32, 1>}, {pipeline_mode = #tpu.pipeline_mode<synchronous>, transform_indices = @transform_8, window_bounds = array<i64: 32, 1>}, {pipeline_mode = #tpu.pipeline_mode<synchronous>, transform_indices = @transform_9, window_bounds = array<i64: 32, 1>}, {transform_indices = @transform_10, window_bounds = array<i64: 1, 32, 128>}]} {
    %c0 = arith.constant 0 : index
    %c0_0 = arith.constant 0 : index
    %c0_1 = arith.constant 0 : index
    %0 = vector.load %arg2[%c0, %c0_0, %c0_1] : memref<1x8x128xbf16, #tpu.memory_space<vmem>>, vector<1x8x128xbf16>
    %1 = vector.shape_cast %0 : vector<1x8x128xbf16> to vector<8x128xbf16>
    %2 = arith.extf %1 : vector<8x128xbf16> to vector<8x128xf32>
    %c0_2 = arith.constant 0 : index
    %c0_3 = arith.constant 0 : index
    %3 = vector.load %arg5[%c0_2, %c0_3] : memref<8x1xf32, #tpu.memory_space<vmem>>, vector<8x1xf32>
    %4 = vector.broadcast %3 : vector<8x1xf32> to vector<8x128xf32>
    %5 = arith.mulf %2, %4 : vector<8x128xf32>
    %c0_4 = arith.constant 0 : index
    %c0_5 = arith.constant 0 : index
    %6 = vector.load %arg6[%c0_4, %c0_5] : memref<8x1xf32, #tpu.memory_space<vmem>>, vector<8x1xf32>
    %7 = vector.broadcast %6 : vector<8x1xf32> to vector<8x128xf32>
    %8 = arith.addf %5, %7 : vector<8x128xf32>
    %cst = arith.constant 0.000000e+00 : f32
    %9 = vector.broadcast %cst : f32 to vector<8x128xf32>
    %10 = arith.maximumf %8, %9 : vector<8x128xf32>
    %c0_6 = arith.constant 0 : index
    %c0_7 = arith.constant 0 : index
    %11 = vector.load %arg7[%c0_6, %c0_7] : memref<32x8xbf16, #tpu.memory_space<vmem>>, vector<32x8xbf16>
    %12 = arith.truncf %10 : vector<8x128xf32> to vector<8x128xbf16>
    %cst_8 = arith.constant dense<0.000000e+00> : vector<32x128xf32>
    %13 = tpu.matmul %11, %12, %cst_8 {dimension_numbers = #tpu.dot_dimension_numbers<[1], [0], [0], [1], [0, 0, 1, 1], [], []>} : vector<32x8xbf16>, vector<8x128xbf16>, vector<32x128xf32> -> vector<32x128xf32>
    %c0_9 = arith.constant 0 : index
    %c0_10 = arith.constant 0 : index
    %14 = vector.load %arg8[%c0_9, %c0_10] : memref<32x1xf32, #tpu.memory_space<vmem>>, vector<32x1xf32>
    %15 = vector.broadcast %14 : vector<32x1xf32> to vector<32x128xf32>
    %16 = arith.mulf %13, %15 : vector<32x128xf32>
    %c0_11 = arith.constant 0 : index
    %c0_12 = arith.constant 0 : index
    %17 = vector.load %arg9[%c0_11, %c0_12] : memref<32x1xf32, #tpu.memory_space<vmem>>, vector<32x1xf32>
    %18 = vector.broadcast %17 : vector<32x1xf32> to vector<32x128xf32>
    %19 = arith.addf %16, %18 : vector<32x128xf32>
    %c0_13 = arith.constant 0 : index
    %c0_14 = arith.constant 0 : index
    %c0_15 = arith.constant 0 : index
    %20 = vector.load %arg4[%c0_13, %c0_14, %c0_15] : memref<1x32x1xf32, #tpu.memory_space<vmem>>, vector<1x32x1xf32>
    %21 = vector.shape_cast %20 : vector<1x32x1xf32> to vector<32x1xf32>
    %22 = vector.broadcast %21 : vector<32x1xf32> to vector<32x128xf32>
    %23 = arith.mulf %19, %22 : vector<32x128xf32>
    %c0_16 = arith.constant 0 : index
    %c0_17 = arith.constant 0 : index
    %c0_18 = arith.constant 0 : index
    %24 = vector.load %arg3[%c0_16, %c0_17, %c0_18] : memref<1x32x128xbf16, #tpu.memory_space<vmem>>, vector<1x32x128xbf16>
    %25 = vector.shape_cast %24 : vector<1x32x128xbf16> to vector<32x128xbf16>
    %26 = arith.extf %25 : vector<32x128xbf16> to vector<32x128xf32>
    %c0_19 = arith.constant 0 : index
    %c0_20 = arith.constant 0 : index
    %27 = vector.load %arg10[%c0_19, %c0_20] : memref<32x1xf32, #tpu.memory_space<vmem>>, vector<32x1xf32>
    %28 = vector.broadcast %27 : vector<32x1xf32> to vector<32x128xf32>
    %29 = arith.mulf %26, %28 : vector<32x128xf32>
    %c0_21 = arith.constant 0 : index
    %c0_22 = arith.constant 0 : index
    %30 = vector.load %arg11[%c0_21, %c0_22] : memref<32x1xf32, #tpu.memory_space<vmem>>, vector<32x1xf32>
    %31 = vector.broadcast %30 : vector<32x1xf32> to vector<32x128xf32>
    %32 = arith.addf %29, %31 : vector<32x128xf32>
    %33 = arith.addf %23, %32 : vector<32x128xf32>
    %cst_23 = arith.constant 0.000000e+00 : f32
    %34 = vector.broadcast %cst_23 : f32 to vector<32x128xf32>
    %35 = arith.maximumf %33, %34 : vector<32x128xf32>
    %c0_24 = arith.constant 0 : index
    %c0_25 = arith.constant 0 : index
    %c0_26 = arith.constant 0 : index
    %36 = vector.load %arg12[%c0_24, %c0_25, %c0_26] : memref<1x32x128xf32, #tpu.memory_space<vmem>>, vector<1x32x128xf32>
    %37 = vector.shape_cast %36 : vector<1x32x128xf32> to vector<32x128xf32>
    %38 = vector.shape_cast %35 : vector<32x128xf32> to vector<1x32x128xf32>
    tpu.vector_store %arg12[%c0_24, %c0_25, %c0_26], %38 {strides = array<i32>} : memref<1x32x128xf32, #tpu.memory_space<vmem>>, vector<1x32x128xf32>,
    return
  }
  func.func @transform_0(%arg0: i32, %arg1: i32) -> (i32, i32, i32) {
    %c0_i32 = arith.constant 0 : i32
    %c0_i32_0 = arith.constant 0 : i32
    return %arg0, %c0_i32, %arg1 : i32, i32, i32
  }
  func.func @transform_1(%arg0: i32, %arg1: i32) -> (i32, i32, i32) {
    %c0_i32 = arith.constant 0 : i32
    %c0_i32_0 = arith.constant 0 : i32
    return %arg0, %c0_i32, %arg1 : i32, i32, i32
  }
  func.func @transform_2(%arg0: i32, %arg1: i32) -> (i32, i32, i32) {
    %c0_i32 = arith.constant 0 : i32
    %c0_i32_0 = arith.constant 0 : i32
    %c0_i32_1 = arith.constant 0 : i32
    return %arg0, %c0_i32, %c0_i32_0 : i32, i32, i32
  }
  func.func @transform_3(%arg0: i32, %arg1: i32) -> (i32, i32) {
    %c0_i32 = arith.constant 0 : i32
    %c0_i32_0 = arith.constant 0 : i32
    %c0_i32_1 = arith.constant 0 : i32
    return %c0_i32, %c0_i32_0 : i32, i32
  }
  func.func @transform_4(%arg0: i32, %arg1: i32) -> (i32, i32) {
    %c0_i32 = arith.constant 0 : i32
    %c0_i32_0 = arith.constant 0 : i32
    %c0_i32_1 = arith.constant 0 : i32
    return %c0_i32, %c0_i32_0 : i32, i32
  }
  func.func @transform_5(%arg0: i32, %arg1: i32) -> (i32, i32) {
    %c0_i32 = arith.constant 0 : i32
    %c0_i32_0 = arith.constant 0 : i32
    %c0_i32_1 = arith.constant 0 : i32
    return %c0_i32, %c0_i32_0 : i32, i32
  }
  func.func @transform_6(%arg0: i32, %arg1: i32) -> (i32, i32) {
    %c0_i32 = arith.constant 0 : i32
    %c0_i32_0 = arith.constant 0 : i32
    %c0_i32_1 = arith.constant 0 : i32
    return %c0_i32, %c0_i32_0 : i32, i32
  }
  func.func @transform_7(%arg0: i32, %arg1: i32) -> (i32, i32) {
    %c0_i32 = arith.constant 0 : i32
    %c0_i32_0 = arith.constant 0 : i32
    %c0_i32_1 = arith.constant 0 : i32
    return %c0_i32, %c0_i32_0 : i32, i32
  }
  func.func @transform_8(%arg0: i32, %arg1: i32) -> (i32, i32) {
    %c0_i32 = arith.constant 0 : i32
    %c0_i32_0 = arith.constant 0 : i32
    %c0_i32_1 = arith.constant 0 : i32
    return %c0_i32, %c0_i32_0 : i32, i32
  }
  func.func @transform_9(%arg0: i32, %arg1: i32) -> (i32, i32) {
    %c0_i32 = arith.constant 0 : i32
    %c0_i32_0 = arith.constant 0 : i32
    %c0_i32_1 = arith.constant 0 : i32
    return %c0_i32, %c0_i32_0 : i32, i32
  }
  func.func @transform_10(%arg0: i32, %arg1: i32) -> (i32, i32, i32) {
    %c0_i32 = arith.constant 0 : i32
    %c0_i32_0 = arith.constant 0 : i32
    return %arg0, %c0_i32, %arg1 : i32, i32, i32
  }
}

</mosaic_0001>

<bundles_post_ra>
// kernel: bottleneck1d_pallas.4
= control target key start
LH: loop header
LB: loop body
LE: loop exit
PB: predicated region body
PF: predicated region fallthrough
CT: control target
= control target key end

     0   :  { %s873_s15 = smov 0   ;;  %s875_s16 = smov 0   ;;  %s1027_s0 = inlined_call_operand.vmem [shape: f32[2,16,512], index: 0, kind: input, shape index: {}]   ;;  %s1028_s1 = inlined_call_operand.vmem [shape: bf16[40,16], index: 1, kind: input, shape index: {}]   ;;  %s1029_s2 = inlined_call_operand.vmem [shape: bf16[2,8,512], index: 2, kind: output, shape index: {0}]   ;;  %s1030_s3 = inlined_call_operand.vmem [shape: bf16[2,32,512], index: 3, kind: output, shape index: {1}]   ;;  %s1031_s4 = inlined_call_operand.vmem [shape: f32[2,40,2], index: 4, kind: output, shape index: {2}]  }
   0x1   :  { %s877_s17 = smov 0   ;;  %s879_s18 = smov 0  }
   0x2   :  { %s881_s19 = smov 0   ;;  %s883_s20 = smov 0  }
   0x3   :  { %s885_s21 = smov 0  }
   0x4 LB: > { %s24_s22 = sadd.s32 1, %s835_s19  ;;  %s27_s23 = sadd.s32 1, %s839_s20  ;;  %s843_s21 = sphi %s885_s21, %s15_s21   ;;  %s839_s20 = sphi %s883_s20, %s1038_s20   ;;  %s835_s19 = sphi %s881_s19, %s1037_s19   ;;  %s831_s18 = sphi %s879_s18, %s1036_s18   ;;  %s827_s17 = sphi %s877_s17, %s1035_s17   ;;  %s823_s16 = sphi %s875_s16, %s1034_s16   ;;  %s819_s15 = sphi %s873_s15, %s1033_s15  }
   0x5   : > { %p25_p0 = scmp.ge.s32.totalorder %s24_s22, 4  ;;  %s662_s24 = sadd.s32 4294967295, %s843_s21  }
   0x6   : > { %p43_p1 = scmp.ne.s32.totalorder %s823_s16, %s819_s15  ;;  %p44_p2 = scmp.eq.s32.totalorder %s843_s21, 0 }
   0x7   : > { %s1040_s22 = smov (%p25_p0, %s24_s22), 0  ;;  %s1042_s23 = smov (!%p25_p0, %s27_s23), %s839_s20 }
   0x8   : > { %p29_p3 = scmp.ge.s32.totalorder %s1042_s23, 2  ;;  %p124_p4 = scmp.eq.s32.totalorder %s662_s24, 7 }
   0x9   : > { %s32_s25 = ssub.s32 %s835_s19, %s1040_s22  ;;  %p45_p5 = por %p44_p2, %p43_p1 }
   0xa   : > { %s1044_s23 = smov (%p29_p3, %s1042_s23), 0  ;;  %p921_p6 = por %p124_p4, %p43_p1 }
   0xb   : > { %s31_s27 = ssub.s32 %s839_s20, %s1044_s23  ;;  %s36_s29 = sadd.s32 1, %s823_s16 }
   0xc   : > { %s33_s28 = sor.u32 %s32_s25, %s31_s27  ;;  %p665_p8 = scmp.ge.s32.totalorder %s843_s21, 8 }
   0xd   : > { %p34_p7 = scmp.eq.s32.totalorder %s33_s28, 0 }
   0xe   : > { %175 = sbr.rel (%p665_p8) target bundleno = 29 (0x1d), region = 20 }
   0xf   : > { %s929_s30 = scalar_select %p34_p7, %s823_s16, %s36_s29  }
  0x15   : > { %178 = sbr.rel (!%p45_p5) target bundleno = 29 (0x1d), region = 24  ;;  %s180_s5 = sand.u32 (%p45_p5), 1, %s823_s16  }
  0x16   : > { %s667_s6 = sshll.u32 (%p45_p5), %s839_s20, 3  ;;  %s666_s7 = sshll.u32 (%p45_p5), %s180_s5, 4 }
  0x17   : > { %s184_s8 = sadd.s32 (%p45_p5), %s835_s19, %s667_s6  ;;  %s182_s13 = scalar_lea.vmem (%p45_p5), [#allocation2], %s666_s7 }
  0x18   : > { %s668_s9 = sshll.u32 (%p45_p5), %s184_s8, 3 }
  0x19   : > { %s186_s12 = scalar_lea.vmem (%p45_p5), %s1027_s0, %s668_s9 }
  0x1a   : > { %v216_v0 = vld [vmem:[%s186_s12] sm:$0xff] (%p45_p5) }
  0x1b   : > { %v218_v1 = vld [vmem:[%s186_s12 + $0x20] sm:$0xff] (%p45_p5)  ;;  %217 = vst [vmem:[%s182_s13] sm:$0xff] (%p45_p5), %v216_v0 }
  0x1c   : > { %219 = vst [vmem:[%s182_s13 + $0x8] sm:$0xff] %v218_v1 }
  0x1d PF: > { %p669_p9 = scmp.ge.s32.totalorder %s843_s21, 1  ;;  %p224_p10 = scmp.lt.s32.totalorder %s843_s21, 9 }
  0x1f   : > { %p225_p11 = pnand %p669_p9, %p224_p10 }
  0x20   : > { %s231_s14 = sand.u32 (!%p225_p11), 1, %s819_s15   ;;  %p268_p12 = scmp.lt.s32.totalorder (!%p225_p11), %s831_s18, 1 }
  0x21   : > { %228 = sbr.rel (%p225_p11) target bundleno = 432 (0x1b0), region = 62  ;;  %s670_s24 = sshll.u32 (!%p225_p11), %s231_s14, 4 }
  0x22   : > { %p270_p13 = scmp.lt.s32.totalorder (!%p225_p11), %s827_s17, 3  ;;  %s233_s15 = scalar_lea.vmem (!%p225_p11), [#allocation2], %s670_s24 }
  0x23   : > { %s955_s13 = scalar_lea.vmem (!%p225_p11), [#allocation3], %s670_s24  ;;  %p675_p0 = scmp.ne.s32.totalorder (!%p225_p11), %s827_s17, 0 }
  0x28   : > { %s269_s25 = scalar_select %p268_p12, %s831_s18, 1 }
  0x29   : > { %s271_s27 = scalar_select %p270_p13, %s827_s17, 3 }
  0x2a   : > { %s672_s28 = sshll.u32 %s269_s25, 2  ;;  %s726_s29 = smul.u32 40, %s269_s25  ;;  %vm286_vm0 = vcmask (!%p675_p0), 15360   ;;  %v845_v2 = vmov (!%p675_p0), 0.0  }
  0x2b   : > { %s273_s5 = sadd.s32 %s672_s28, %s271_s27  ;;  %285 = sbr.rel (%p675_p0) target bundleno = 50 (0x32), region = 70 }
  0x2c   : > { %s673_s6 = sshll.u32 %s273_s5, 2  ;;  %s948_s9 = scalar_lea.vmem %s1031_s4, %s726_s29 }
  0x2d   : > { %s953_s12 = scalar_lea.vmem %s1029_s2, %s673_s6  ;;  %287 = vst.msk [vmem:[%s948_s9] sm:$0xff] (!%p675_p0), %vm286_vm0, %v845_v2  ;;  %288 = vst.msk [vmem:[%s948_s9 + $0x8] sm:$0xff] (!%p675_p0), %vm286_vm0, %v845_v2 }
  0x2e   : > { %289 = vst.msk [vmem:[%s948_s9 + $0x10] sm:$0xff] (!%p675_p0), %vm286_vm0, %v845_v2  ;;  %290 = vst.msk [vmem:[%s948_s9 + $0x18] sm:$0xff] (!%p675_p0), %vm286_vm0, %v845_v2 }
  0x2f   : > { %291 = vst.msk [vmem:[%s948_s9 + $0x20] sm:$0xff] (!%p675_p0), %vm286_vm0, %v845_v2 }
  0x32 PF: > { %v292_v3 = vld [vmem:[%s233_s15] sm:$0xff]  ;;  %v293_v4 = vld [vmem:[%s233_s15 + $0x8] sm:$0xff]  ;;  %v846_v5 = vmov 0.0   ;;  %vm847_vm1 = vmmov 0   ;;  %vm313_vm2 = vcmask 130048   ;;  %vm426_vm3 = vcmask 7168  }
  0x33   : > { %710 = vmatprep.subr.bf16.mxu0 %v846_v5  ;;  %724 = vmatprep.subr.bf16.mxu1 %v846_v5  ;;  %v294_v6 = vpack.c.bf16 %v293_v4, %v292_v3  ;;  %v786_v7 = vld [vmem:[%s1028_s1] sm:$0xff]   ;;  %v787_v8 = vld [vmem:[%s1028_s1 + $0x8] sm:$0xff]   ;;  %v788_v9 = vld [vmem:[%s1028_s1 + $0x10] ss:$0 sps:$4 sm:$0xff]   ;;  %vm442_vm4 = vcmask 15360   ;;  %s687_s5 = sshll.u32 (%p921_p6), %s831_s18, 4 }
  0x34   : > { %712 = vmatprep.mubr.msk.bf16.mxu0 %vm847_vm1, %v846_v5  ;;  %716 = vmatprep.mubr.msk.bf16.mxu1 %vm847_vm1, %v846_v5  ;;  %v432_v34 = vld [vmem:[%s948_s9] sm:$0xff]  ;;  %v433_v35 = vld [vmem:[%s948_s9 + $0x8] sm:$0xff]  ;;  %s472_s6 = sadd.s32 (%p921_p6), %s827_s17, %s687_s5 }
  0x35   : > { %711 = vmatpush3.bf16.msra.mxu0 %v294_v6  ;;  %725 = vmatpush3.bf16.msra.mxu1 %v294_v6  ;;  %v434_v42 = vld [vmem:[%s948_s9 + $0x10] sm:$0xff]  ;;  %v435_v48 = vld [vmem:[%s948_s9 + $0x18] sm:$0xff]  ;;  %s688_s7 = sshll.u32 (%p921_p6), %s472_s6, 2 }
  0x36   : > { %v436_v47 = vld [vmem:[%s948_s9 + $0x20] sm:$0xff] }
  0x38   : > { %713 = vmatmul.mubr.msk.bf16.vlgmr.msra.gmra.mrb[0].mxu0 %vm313_vm2, %v786_v7  ;;  %717 = vmatmul.mubr.msk.bf16.vlgmr.msra.gmra.mrb[0].mxu1 %vm313_vm2, %v787_v8 }
  0x39   : > { %720 = vmatprep.mubr.msk.bf16.mxu1 %vm847_vm1, %v846_v5 }
  0x40   : > { %721 = vmatmul.mubr.msk.bf16.gmra.mrb[4].mxu1 %vm313_vm2, %v788_v9 }
 0x10b   : > { %v357_v10 = vpop.f32.mrb[0].mxu0  ;;  %v365_v11 = vpop.f32.mrb[0].mxu1 }
 0x10c   : > { %v379_v12 = vpack.c.bf16 %v357_v10, %v357_v10  ;;  %405 = vadd.xlane.f32.xlu1 %v365_v11  ;;  %v718_v13 = vpop.f32.mrb[1].mxu1  ;;  %401 = vadd.xlane.f32.xlu0 %v357_v10  ;;  %v714_v14 = vpop.f32.mrb[1].mxu0  ;;  %v411_v20 = vmul.f32 %v357_v10, %v357_v10  ;;  %v413_v27 = vmul.f32 %v365_v11, %v365_v11 }
 0x10d   : > { %v360_v15 = vpop.f32.mrb[2].mxu0  ;;  %v368_v16 = vpop.f32.mrb[2].mxu1 }
 0x10e   : > { %380 = vst [vmem:[%s953_s12] sm:$0xf] %v379_v12  ;;  %v698_v17 = vpack.c.bf16 %v365_v11, %v360_v15  ;;  %v715_v18 = vpop.f32.mrb[3].mxu0  ;;  %v719_v19 = vpop.f32.mrb[3].mxu1  ;;  %v412_v21 = vmul.f32 %v360_v15, %v360_v15  ;;  %v414_v29 = vmul.f32 %v368_v16, %v368_v16 }
 0x110   : > { %699 = vst [vmem:[%s955_s13] sm:$0xff] %v698_v17   ;;  %407 = vadd.xlane.f32.xlu1 %v368_v16  ;;  %403 = vadd.xlane.f32.xlu0 %v360_v15 }
 0x113   : > { %v373_v22 = vpop.f32.mrb[4].mxu1 }
 0x114   : > { %v703_v23 = vpack.c.bf16 %v373_v22, %v368_v16  ;;  %416 = vadd.xlane.f32.xlu1 %v411_v20  ;;  %418 = vadd.xlane.f32.xlu0 %v412_v21  ;;  %v722_v24 = vpop.f32.mrb[5].mxu1  ;;  %v415_v28 = vmul.f32 %v373_v22, %v373_v22 }
 0x115   : > { %v376_v25 = vpop.f32.mrb[6].mxu1 }
 0x116   : > { %705 = vst [vmem:[%s955_s13 + $0x8] sm:$0xff] %v703_v23   ;;  %v723_v26 = vpop.f32.mrb[7].mxu1 }
 0x117   : > { %v490_v55 = vld [vmem:[%s955_s13] sm:$0xf] (%p921_p6)  ;;  %v492_v56 = vld [vmem:[%s955_s13 + $0x4] sm:$0xf] (%p921_p6) }
 0x118   : > { %420 = vadd.xlane.f32.xlu1 %v413_v27  ;;  %409 = vadd.xlane.f32.xlu0 %v373_v22 }
 0x11c   : > { %424 = vadd.xlane.f32.xlu1 %v415_v28  ;;  %422 = vadd.xlane.f32.xlu0 %v414_v29 }
 0x11d   : > { %v494_v57 = vld [vmem:[%s955_s13 + $0x8] sm:$0xf] (%p921_p6)  ;;  %v496_v58 = vld [vmem:[%s955_s13 + $0xc] sm:$0xf] (%p921_p6) }
 0x199   : > { %v406_v30 = vpop.xlane.xlu1 %405  ;;  %v402_v31 = vpop.xlane.xlu0 %401 }
 0x19d   : > { %v408_v32 = vpop.xlane.xlu1 %407  ;;  %v404_v33 = vpop.xlane.xlu0 %403 }
 0x1a1   : > { %v417_v36 = vpop.xlane.xlu1 %416  ;;  %v419_v37 = vpop.xlane.xlu0 %418 }
 0x1a2   : > { %v427_v38 = vsel %vm426_vm3, %v402_v31, %v417_v36  ;;  %v428_v39 = vsel %vm426_vm3, %v404_v33, %v419_v37 }
 0x1a3   : > { %v437_v40 = vadd.f32 %v432_v34, %v427_v38  ;;  %v438_v41 = vadd.f32 %v433_v35, %v428_v39 }
 0x1a5   : > { %443 = vst.msk [vmem:[%s948_s9] sm:$0xff] %vm442_vm4, %v437_v40  ;;  %444 = vst.msk [vmem:[%s948_s9 + $0x8] sm:$0xff] %vm442_vm4, %v438_v41  ;;  %v421_v43 = vpop.xlane.xlu1 %420  ;;  %v410_v44 = vpop.xlane.xlu0 %409 }
 0x1a6   : > { %v429_v45 = vsel %vm426_vm3, %v406_v30, %v421_v43 }
 0x1a7   : > { %v439_v46 = vadd.f32 %v434_v42, %v429_v45  ;;  %470 = sbr.rel (!%p921_p6) target bundleno = 432 (0x1b0), region = 78 }
 0x1a9   : > { %445 = vst.msk [vmem:[%s948_s9 + $0x10] sm:$0xff] %vm442_vm4, %v439_v46  ;;  %v425_v49 = vpop.xlane.xlu1 %424  ;;  %v423_v50 = vpop.xlane.xlu0 %422 }
 0x1aa   : > { %v431_v51 = vsel %vm426_vm3, %v410_v44, %v425_v49  ;;  %v430_v52 = vsel %vm426_vm3, %v408_v32, %v423_v50 }
 0x1ab   : > { %v441_v53 = vadd.f32 %v436_v47, %v431_v51  ;;  %v440_v54 = vadd.f32 %v435_v48, %v430_v52 }
 0x1ad   : > { %447 = vst.msk [vmem:[%s948_s9 + $0x20] sm:$0xff] %vm442_vm4, %v441_v53  ;;  %446 = vst.msk [vmem:[%s948_s9 + $0x18] sm:$0xff] %vm442_vm4, %v440_v54  ;;  %s474_s9 = scalar_lea.vmem (%p921_p6), %s1030_s3, %s688_s7 }
 0x1ae   : > { %491 = vst [vmem:[%s474_s9] sm:$0xf] %v490_v55  ;;  %493 = vst [vmem:[%s474_s9 + $0x10] sm:$0xf] %v492_v56 }
 0x1af   : > { %495 = vst [vmem:[%s474_s9 + $0x20] sm:$0xf] %v494_v57  ;;  %497 = vst [vmem:[%s474_s9 + $0x30] sm:$0xf] %v496_v58 }
 0x1b0 PF: > { %s15_s21 = sadd.s32 1, %s843_s21   ;;  %s1033_s15 = smov %s823_s16 }
 0x1b1   : > { %p12_p1 = scmp.ge.s32.totalorder %s15_s21, 10   ;;  %s1034_s16 = smov %s929_s30 }
 0x1b2   : > { %s1035_s17 = smov %s835_s19  ;;  %s1036_s18 = smov %s839_s20 }
 0x1b3   : > { %s1037_s19 = smov %s1040_s22  ;;  %s1038_s20 = smov %s1044_s23 }
 0x1b4   :  { %14 = sbr.rel (!%p12_p1) target bundleno = 4 (0x4), region = 170 }

// kernel: bottleneck1d_pallas.6
= control target key start
LH: loop header
LB: loop body
LE: loop exit
PB: predicated region body
PF: predicated region fallthrough
CT: control target
= control target key end

     0   :  { %s572_s15 = smov 0   ;;  %s574_s16 = smov 0   ;;  %s657_s0 = inlined_call_operand.vmem [shape: bf16[2,8,512], index: 0, kind: input, shape index: {}]   ;;  %s658_s1 = inlined_call_operand.vmem [shape: f32[8,1], index: 1, kind: input, shape index: {}]   ;;  %s659_s2 = inlined_call_operand.vmem [shape: f32[8,1], index: 2, kind: input, shape index: {}]   ;;  %s660_s3 = inlined_call_operand.vmem [shape: bf16[32,8], index: 3, kind: input, shape index: {}]   ;;  %s661_s4 = inlined_call_operand.vmem [shape: f32[2,32,2], index: 4, kind: output, shape index: {}]  }
   0x1   :  { %s576_s17 = smov 0   ;;  %s578_s18 = smov 0  }
   0x2   :  { %s580_s19 = smov 0  }
   0x3 LB: > { %s23_s20 = sadd.s32 1, %s535_s17  ;;  %s26_s21 = sadd.s32 1, %s539_s18  ;;  %s543_s19 = sphi %s580_s19, %s14_s19   ;;  %s539_s18 = sphi %s578_s18, %s665_s18   ;;  %s535_s17 = sphi %s576_s17, %s664_s17   ;;  %s531_s16 = sphi %s574_s16, %s663_s16   ;;  %s527_s15 = sphi %s572_s15, %s662_s15  }
   0x4   : > { %p24_p0 = scmp.ge.s32.totalorder %s23_s20, 4  ;;  %p437_p1 = scmp.ge.s32.totalorder %s543_s19, 1 }
   0x5   : > { %p179_p2 = scmp.lt.s32.totalorder %s543_s19, 9 }
   0x6   : > { %s667_s20 = smov (%p24_p0, %s23_s20), 0  ;;  %s669_s21 = smov (!%p24_p0, %s26_s21), %s539_s18 }
   0x7   : > { %p180_p3 = pnand %p437_p1, %p179_p2  ;;  %p28_p4 = scmp.ge.s32.totalorder %s669_s21, 2 }
   0x8   : > { %p208_p5 = scmp.lt.s32.totalorder (!%p180_p3), %s531_s16, 1  ;;  %p210_p6 = scmp.lt.s32.totalorder (!%p180_p3), %s527_s15, 3 }
   0x9   : > { %s671_s21 = smov (%p28_p4, %s669_s21), 0  ;;  %183 = sbr.rel (%p180_p3) target bundleno = 550 (0x226), region = 36 }
   0xa   : > { %p442_p7 = scmp.ne.s32.totalorder (!%p180_p3), %s527_s15, 0 }
  0x10   : > { %s673_s16 = smov (!%p208_p5, %s531_s16), 1  ;;  %225 = sbr.rel (%p442_p7) target bundleno = 23 (0x17), region = 40 }
  0x11   : > { %s211_s22 = scalar_select %p210_p6, %s527_s15, 3 }
  0x12   : > { %s438_s23 = sshll.u32 %s673_s16, 2  ;;  %s449_s24 = sshll.u32 %s673_s16, 5  ;;  %vm226_vm0 = vcmask (!%p442_p7), 15360   ;;  %v545_v0 = vmov (!%p442_p7), 0.0  }
  0x13   : > { %s213_s25 = sadd.s32 %s438_s23, %s211_s22  ;;  %s605_s28 = scalar_lea.vmem %s661_s4, %s449_s24 }
  0x14   : > { %s439_s29 = sshll.u32 %s213_s25, 2  ;;  %227 = vst.msk [vmem:[%s605_s28] sm:$0xff] (!%p442_p7), %vm226_vm0, %v545_v0  ;;  %228 = vst.msk [vmem:[%s605_s28 + $0x8] sm:$0xff] (!%p442_p7), %vm226_vm0, %v545_v0 }
  0x15   : > { %s215_s6 = scalar_lea.vmem %s657_s0, %s439_s29  ;;  %229 = vst.msk [vmem:[%s605_s28 + $0x10] sm:$0xff] (!%p442_p7), %vm226_vm0, %v545_v0  ;;  %230 = vst.msk [vmem:[%s605_s28 + $0x18] sm:$0xff] (!%p442_p7), %vm226_vm0, %v545_v0 }
  0x17 PF: > { %v233_v1 = vld [vmem:[%s658_s1] sm:$0xff]  ;;  %v546_v2 = vmov 0   ;;  %vm263_vm1 = vcmask 64512   ;;  %vm270_vm2 = vcmask 1043456   ;;  %v504_v14 = vld [vmem:[%s660_s3 + $0x8] sm:$0xff]   ;;  %vm343_vm3 = vcmask 7168  }
  0x18   : > { %502 = vset.pattern.permute.xlu0 %v546_v2  ;;  %v240_v3 = vld [vmem:[%s659_s2] sm:$0xff]  ;;  %vm356_vm4 = vcmask 15360  }
  0x19   : > { %236 = vperm.xlu0 %502, %v233_v1   ;;  %v503_v4 = vld [vmem:[%s660_s3] sm:$0xff]  }
  0x1a   : > { %455 = vmatprep.mubr.msk.bf16.mxu0 %vm263_vm1, %v503_v4  ;;  %v231_v5 = vld [vmem:[%s215_s6] sm:$0xf] }
  0x1b   : > { %v232_v6 = vunpack.c.l.bf16 %v231_v5  ;;  %v348_v31 = vld [vmem:[%s605_s28] sm:$0xff]  ;;  %v349_v35 = vld [vmem:[%s605_s28 + $0x8] sm:$0xff] }
  0x1c   : > { %v350_v25 = vld [vmem:[%s605_s28 + $0x10] sm:$0xff]  ;;  %v351_v39 = vld [vmem:[%s605_s28 + $0x18] sm:$0xff] }
  0x1d   : > { %243 = vperm.xlu0 %502, %v240_v3  }
  0x98   : > { %v237_v7 = vpop.permute.xlu0 %236 }
  0x99   : > { %v239_v8 = vmul.f32 %v237_v7, %v232_v6 }
  0x9c   : > { %v244_v9 = vpop.permute.xlu0 %243 }
  0x9d   : > { %v246_v10 = vadd.f32 %v244_v9, %v239_v8 }
  0x9f   : > { %v247_v11 = vmax.f32 %v246_v10, 0.0 }
  0xa1   : > { %v252_v12 = vpack.c.bf16 %v247_v11, %v247_v11 }
  0xa3   : > { %459 = vmatprep.subr.msk.bf16.mxu0 %vm270_vm2, %v252_v12  ;;  %v272_v13 = vsel %vm270_vm2, %v252_v12, 0 }
  0xa4   : > { %454 = vmatpush3.bf16.msra.mxu0 %v272_v13 }
  0xa7   : > { %456 = vmatmul.mubr.msk.bf16.vlgmr.msra.gmra.mrb[0].mxu0 %vm263_vm1, %v504_v14 }
 0x17a   : > { %v457_v15 = vpop.f32.mrb[0].mxu0 }
 0x17b   : > { %327 = vadd.xlane.f32.xlu0 %v457_v15  ;;  %v308_v16 = vpop.f32.mrb[1].mxu0  ;;  %v333_v19 = vmul.f32 %v457_v15, %v457_v15 }
 0x17c   : > { %323 = vadd.xlane.f32.xlu1 %v308_v16  ;;  %v458_v17 = vpop.f32.mrb[2].mxu0  ;;  %v331_v20 = vmul.f32 %v308_v16, %v308_v16 }
 0x17d   : > { %v311_v18 = vpop.f32.mrb[3].mxu0  ;;  %v334_v22 = vmul.f32 %v458_v17, %v458_v17 }
 0x17e   : > { %v332_v21 = vmul.f32 %v311_v18, %v311_v18 }
 0x180   : > { %329 = vadd.xlane.f32.xlu1 %v458_v17 }
 0x184   : > { %339 = vadd.xlane.f32.xlu1 %v333_v19 }
 0x188   : > { %325 = vadd.xlane.f32.xlu1 %v311_v18 }
 0x18c   : > { %335 = vadd.xlane.f32.xlu1 %v331_v20 }
 0x190   : > { %337 = vadd.xlane.f32.xlu1 %v332_v21 }
 0x194   : > { %341 = vadd.xlane.f32.xlu1 %v334_v22 }
 0x208   : > { %v328_v26 = vpop.xlane.xlu0 %327 }
 0x209   : > { %v324_v23 = vpop.xlane.xlu1 %323 }
 0x20d   : > { %v330_v24 = vpop.xlane.xlu1 %329 }
 0x211   : > { %v340_v27 = vpop.xlane.xlu1 %339 }
 0x212   : > { %v346_v28 = vsel %vm343_vm3, %v328_v26, %v340_v27 }
 0x213   : > { %v354_v29 = vadd.f32 %v350_v25, %v346_v28 }
 0x215   : > { %359 = vst.msk [vmem:[%s605_s28 + $0x10] sm:$0xff] %vm356_vm4, %v354_v29  ;;  %v326_v30 = vpop.xlane.xlu1 %325 }
 0x219   : > { %v336_v32 = vpop.xlane.xlu1 %335 }
 0x21a   : > { %v344_v33 = vsel %vm343_vm3, %v324_v23, %v336_v32 }
 0x21b   : > { %v352_v34 = vadd.f32 %v348_v31, %v344_v33 }
 0x21d   : > { %357 = vst.msk [vmem:[%s605_s28] sm:$0xff] %vm356_vm4, %v352_v34  ;;  %v338_v36 = vpop.xlane.xlu1 %337 }
 0x21e   : > { %v345_v37 = vsel %vm343_vm3, %v326_v30, %v338_v36 }
 0x21f   : > { %v353_v38 = vadd.f32 %v349_v35, %v345_v37 }
 0x221   : > { %358 = vst.msk [vmem:[%s605_s28 + $0x8] sm:$0xff] %vm356_vm4, %v353_v38  ;;  %v342_v40 = vpop.xlane.xlu1 %341 }
 0x222   : > { %v347_v41 = vsel %vm343_vm3, %v330_v24, %v342_v40 }
 0x223   : > { %v355_v42 = vadd.f32 %v351_v39, %v347_v41 }
 0x225   : > { %360 = vst.msk [vmem:[%s605_s28 + $0x18] sm:$0xff] %vm356_vm4, %v355_v42 }
 0x226 PF: > { %s14_s19 = sadd.s32 1, %s543_s19   ;;  %s662_s15 = smov %s535_s17 }
 0x227   : > { %p11_p8 = scmp.ge.s32.totalorder %s14_s19, 10   ;;  %s663_s16 = smov %s539_s18 }
 0x228   : > { %s664_s17 = smov %s667_s20  ;;  %s665_s18 = smov %s671_s21 }
 0x229   :  { %13 = sbr.rel (!%p11_p8) target bundleno = 3 (0x3), region = 70 }

// kernel: bottleneck1d_pallas.5
= control target key start
LH: loop header
LB: loop body
LE: loop exit
PB: predicated region body
PF: predicated region fallthrough
CT: control target
= control target key end

     0   :  { %s937_s27 = smov 0   ;;  %s939_s28 = smov 0   ;;  %s1053_s0 = inlined_call_operand.vmem [shape: bf16[2,8,512], index: 0, kind: input, shape index: {}, may-alias: {0,1,2}]   ;;  %s1054_s1 = inlined_call_operand.vmem [shape: bf16[2,8,512], index: 1, kind: input, shape index: {}, may-alias: {0,1,2}]   ;;  %s1055_s2 = inlined_call_operand.vmem [shape: bf16[2,8,512], index: 2, kind: input, shape index: {}, may-alias: {0,1,2}]   ;;  %s1056_s3 = inlined_call_operand.vmem [shape: f32[8,1], index: 3, kind: input, shape index: {}]   ;;  %s1057_s4 = inlined_call_operand.vmem [shape: f32[8,1], index: 4, kind: input, shape index: {}]   ;;  %s1058_s5 = inlined_call_operand.vmem [shape: f32[8,3], index: 5, kind: input, shape index: {}]   ;;  %s1059_s6 = inlined_call_operand.vmem [shape: bf16[8,8], index: 6, kind: input, shape index: {}]   ;;  %s1060_s7 = inlined_call_operand.vmem [shape: bf16[2,8,512], index: 7, kind: output, shape index: {0}]   ;;  %s1061_s8 = inlined_call_operand.vmem [shape: f32[2,8,2], index: 8, kind: output, shape index: {1}]  }
   0x1   :  { %s941_s29 = smov 0   ;;  %s943_s30 = smov 0  }
   0x2   :  { %s945_s9 = smov 0  }
   0x3 LB: > { %1063 = sst [smem:[#allocation2_spill]] %s878_s30  ;;  %s28_s10 = sadd.s32 1, %s874_s29  ;;  %s882_s9 = sphi %s945_s9, %s19_s9   ;;  %s878_s30 = sphi %s943_s30, %s1070_s30   ;;  %s874_s29 = sphi %s941_s29, %s1072_s29   ;;  %s870_s28 = sphi %s939_s28, %s1068_s28   ;;  %s866_s27 = sphi %s937_s27, %s1071_s27  }
   0x4   : > { %s31_s11 = sadd.s32 1, %s878_s30  ;;  %p29_p0 = scmp.ge.s32.totalorder %s28_s10, 4 }
   0x5   : > { %p760_p1 = scmp.ge.s32.totalorder %s882_s9, 1  ;;  %p338_p2 = scmp.lt.s32.totalorder %s882_s9, 9 }
   0x6   : > { %s1074_s10 = smov (%p29_p0, %s28_s10), 0  ;;  %s1076_s11 = smov (!%p29_p0, %s31_s11), %s878_s30 }
   0x7   : > { %1064 = sst [smem:[#allocation3_spill]] %s1074_s10  ;;  %p339_p3 = pnand %p760_p1, %p338_p2 }
   0x8   : > { %p33_p4 = scmp.ge.s32.totalorder %s1076_s11, 2  ;;  %p404_p5 = scmp.lt.s32.totalorder (!%p339_p3), %s870_s28, 1 }
   0x9   : > { %342 = sbr.rel (%p339_p3) target bundleno = 660 (0x294), region = 48  ;;  %p406_p6 = scmp.lt.s32.totalorder (!%p339_p3), %s866_s27, 3 }
   0xa   : > { %s1078_s11 = smov (%p33_p4, %s1076_s11), 0  ;;  %s763_s12 = sadd.s32 (!%p339_p3), 4294967295, %s866_s27 }
   0xb   : > { %1065 = sst [smem:[#allocation4_spill]] %s1078_s11  ;;  %s426_s13 = sadd.s32 (!%p339_p3), 1, %s866_s27 }
   0xc   : > { %p413_p7 = scmp.gt.s32.totalorder (!%p339_p3), %s763_s12, 0  ;;  %p764_p8 = scmp.lt.s32.totalorder (!%p339_p3), %s763_s12, 3 }
   0xd   : > { %p427_p9 = scmp.lt.s32.totalorder (!%p339_p3), %s426_s13, 3  ;;  %p453_p10 = scmp.eq.s32.totalorder (!%p339_p3), %s866_s27, 0 }
   0xe   : > { %p779_p11 = scmp.ne.s32.totalorder (!%p339_p3), %s866_s27, 0 }
  0x10   : > { %s1080_s28 = smov (!%p404_p5, %s870_s28), 1  ;;  %s1082_s12 = smov (!%p413_p7, %s763_s12), 0 }
  0x11   : > { %s407_s14 = scalar_select %p406_p6, %s866_s27, 3 }
  0x12   : > { %s761_s15 = sshll.u32 %s1080_s28, 2  ;;  %s1084_s13 = smov (!%p427_p9, %s426_s13), 3  ;;  %vm457_vm0 = vcmask (!%p779_p11), 15360   ;;  %v884_v0 = vmov (!%p779_p11), 0.0  }
  0x13   : > { %s409_s16 = sadd.s32 %s761_s15, %s407_s14  ;;  %s1086_s12 = smov (!%p764_p8, %s1082_s12), 3 }
  0x14   : > { %s973_s17 = sshll.u32 %s409_s16, 2  ;;  %s1088_s13 = smov (!%p427_p9, %s1084_s13), 3 }
  0x15   : > { %s420_s24 = sadd.s32 %s1086_s12, %s761_s15  ;;  %s778_s25 = sshll.u32 %s1080_s28, 3 }
  0x16   : > { %s983_s26 = sshll.u32 %s420_s24, 2  ;;  %s434_s14 = sadd.s32 %s761_s15, %s1088_s13 }
  0x17   : > { %s422_s10 = scalar_lea.vmem %s1054_s1, %s983_s26  ;;  %s775_s18 = sshll.u32 %s434_s14, 2 }
  0x18   : > { %s436_s21 = scalar_lea.vmem %s1055_s2, %s775_s18  ;;  %s995_s30 = scalar_lea.vmem %s1061_s8, %s778_s25 }
  0x19   : > { %456 = sbr.rel (%p779_p11) target bundleno = 32 (0x20), region = 52  ;;  %458 = vst.msk [vmem:[%s995_s30] sm:$0xff] (!%p779_p11), %vm457_vm0, %v884_v0 }
  0x20 PF: > { %v459_v1 = vld [vmem:[%s1056_s3] sm:$0xff]  ;;  %v885_v3 = vmov 0   ;;  %s886_s12 = smov 127   ;;  %v887_v6 = vmov 1   ;;  %v888_v10 = vmov 2   ;;  %s1066_s19 = scalar_lea.vmem %s1053_s0, %s973_s17  ;;  %v890_v23 = vmov 0.0  }
  0x21   : > { %v487_v2 = vld [vmem:[%s436_s21] sm:$0xf]  ;;  %841 = vset.pattern.permute.xlu0 %v885_v3  ;;  %478 = vrot.lane.b32.xlu1 %v459_v1, %s886_s12  ;;  %s492_s14 = scalar_select %p453_p10, 1, 0  ;;  %vm891_vm3 = vmmov 0   ;;  %vm509_vm4 = vcmask 7168  }
  0x22   : > { %v488_v4 = vunpack.c.l.bf16 %v487_v2  ;;  %465 = vperm.xlu0 %841, %v459_v1   ;;  %v460_v5 = vld [vmem:[%s1057_s4] sm:$0xff]  ;;  %842 = vset.pattern.permute.xlu1 %v887_v6  ;;  %s889_s21 = smov 1   ;;  %p496_p12 = scmp.eq.s32.totalorder %s866_s27, 3  ;;  %vm518_vm5 = vcmask 1039360   ;;  %vm545_vm6 = vcmask 1043456   ;;  %vm541_vm7 = vcmask 64512  }
  0x23   : > { %v520_v9 = vld [vmem:[%s1058_s5] sm:$0xff]  ;;  %v493_v15 = vstv %s492_s14  ;;  %787 = vmatprep.subr.bf16.mxu0 %v890_v23  ;;  %789 = vmatprep.mubr.msk.bf16.mxu0 %vm891_vm3, %v890_v23  ;;  %s1067_s11 = scalar_lea.vmem %s1060_s7, %s973_s17  ;;  %vm599_vm8 = vcmask 15360  }
  0x24   : > { %v489_v7 = vmul.f32 %v488_v4, %v459_v1  ;;  %v476_v11 = vld [vmem:[%s422_s10] sm:$0xf]  ;;  %vm494_vm1 = vcmp.eq.s32.totalorder %v493_v15, 1  ;;  %s497_s10 = scalar_select %p496_p12, 1, 0 }
  0x25   : > { %482 = vrot.lane.b32.xlu1 %v460_v5, %s886_s12  ;;  %v477_v12 = vunpack.c.l.bf16 %v476_v11  ;;  %v461_v20 = vld [vmem:[%s1066_s19] sm:$0xf] }
  0x26   : > { %v490_v8 = vadd.f32 %v489_v7, %v460_v5  ;;  %471 = vperm.xlu0 %841, %v460_v5   ;;  %v462_v21 = vunpack.c.l.bf16 %v461_v20  ;;  %v498_v26 = vstv %s497_s10  ;;  %v539_v47 = vld [vmem:[%s1059_s6] sm:$0xf] }
  0x27   : > { %vm499_vm2 = vcmp.eq.s32.totalorder %v498_v26, 1  ;;  %v597_v54 = vld [vmem:[%s995_s30] sm:$0xff] }
  0x28   : > { %v491_v28 = vmax.f32 %v490_v8, 0.0 }
  0x29   : > { %528 = vperm.xlu1 %842, %v520_v9  }
  0x2a   : > { %523 = vperm.xlu0 %841, %v520_v9   ;;  %v500_v30 = vsel %vm499_vm2, 0.0, %v491_v28 }
  0x2e   : > { %843 = vset.pattern.permute.xlu0 %v888_v10 }
  0x2f   : > { %534 = vperm.xlu0 %843, %v520_v9  }
  0x93   : > { %v479_v13 = vpop.permute.xlu1 %478 }
  0x94   : > { %v481_v14 = vmul.f32 %v479_v13, %v477_v12 }
  0x97   : > { %v483_v16 = vpop.permute.xlu1 %482 }
  0x98   : > { %v485_v17 = vadd.f32 %v483_v16, %v481_v14 }
  0x9a   : > { %v486_v18 = vmax.f32 %v485_v17, 0.0 }
  0x9c   : > { %v495_v19 = vsel %vm494_vm1, 0.0, %v486_v18 }
  0x9d   : > { %502 = vrot.lane.b32.xlu1 %v495_v19, %s889_s21 }
  0xa1   : > { %v466_v22 = vpop.permute.xlu0 %465 }
  0xa2   : > { %v468_v24 = vmul.f32 %v466_v22, %v462_v21 }
  0xa5   : > { %v472_v25 = vpop.permute.xlu0 %471 }
  0xa6   : > { %v474_v27 = vadd.f32 %v472_v25, %v468_v24 }
  0xa8   : > { %v475_v29 = vmax.f32 %v474_v27, 0.0  ;;  %v529_v31 = vpop.permute.xlu1 %528 }
  0xa9   : > { %v524_v32 = vpop.permute.xlu0 %523 }
  0xaa   : > { %511 = vrot.lane.b32.xlu0 %v475_v29, %s886_s12  ;;  %506 = vrot.lane.b32.xlu1 %v475_v29, %s889_s21  ;;  %v531_v38 = vmul.f32 %v529_v31, %v475_v29 }
  0xae   : > { %515 = vrot.lane.b32.xlu1 %v500_v30, %s886_s12  ;;  %v535_v34 = vpop.permute.xlu0 %534 }
 0x10f   : > { %v503_v33 = vpop.permute.xlu1 %502 }
 0x11c   : > { %v507_v35 = vpop.permute.xlu1 %506  ;;  %v512_v39 = vpop.permute.xlu0 %511 }
 0x11d   : > { %v510_v36 = vsel %vm509_vm4, %v503_v33, %v507_v35 }
 0x11e   : > { %v526_v37 = vmul.f32 %v524_v32, %v510_v36 }
 0x120   : > { %v516_v40 = vpop.permute.xlu1 %515  ;;  %v532_v42 = vadd.f32 %v531_v38, %v526_v37 }
 0x121   : > { %v519_v41 = vsel %vm518_vm5, %v512_v39, %v516_v40 }
 0x122   : > { %v537_v43 = vmul.f32 %v535_v34, %v519_v41 }
 0x124   : > { %v538_v44 = vadd.f32 %v537_v43, %v532_v42 }
 0x126   : > { %v540_v45 = vpack.c.bf16 %v538_v44, %v538_v44 }
 0x128   : > { %v547_v46 = vsel %vm545_vm6, %v540_v45, 0 }
 0x129   : > { %788 = vmatpush3.bf16.msra.mxu0 %v547_v46 }
 0x12c   : > { %790 = vmatmul.mubr.msk.bf16.vlgmr.msra.gmra.mrb[0].mxu0 %vm541_vm7, %v539_v47 }
 0x1ff   : > { %v583_v48 = vpop.f32.mrb[0].mxu0 }
 0x200   : > { %v589_v49 = vpack.c.bf16 %v583_v48, %v583_v48  ;;  %591 = vadd.xlane.f32.xlu0 %v583_v48  ;;  %v791_v50 = vpop.f32.mrb[1].mxu0  ;;  %v593_v51 = vmul.f32 %v583_v48, %v583_v48 }
 0x201   : > { %v586_v52 = vpop.f32.mrb[2].mxu0 }
 0x202   : > { %590 = vst [vmem:[%s1067_s11] sm:$0xf] %v589_v49  ;;  %594 = vadd.xlane.f32.xlu1 %v593_v51  ;;  %v792_v53 = vpop.f32.mrb[3].mxu0 }
 0x28d   : > { %v592_v55 = vpop.xlane.xlu0 %591 }
 0x28f   : > { %v595_v56 = vpop.xlane.xlu1 %594 }
 0x290   : > { %v596_v57 = vsel %vm509_vm4, %v592_v55, %v595_v56 }
 0x291   : > { %v598_v58 = vadd.f32 %v597_v54, %v596_v57 }
 0x293   : > { %600 = vst.msk [vmem:[%s995_s30] sm:$0xff] %vm599_vm8, %v598_v58 }
 0x294 PF: > { %s19_s9 = sadd.s32 1, %s882_s9   ;;  %s1068_s28 = sld [smem:[#allocation2_spill]] }
 0x295   : > { %p16_p13 = scmp.ge.s32.totalorder %s19_s9, 10   ;;  %s1069_s12 = sld [smem:[#allocation3_spill]] }
 0x296   : > { %s1070_s30 = sld [smem:[#allocation4_spill]]  ;;  %s1071_s27 = smov %s874_s29 }
 0x297   :  { %18 = sbr.rel (!%p16_p13) target bundleno = 3 (0x3), region = 100 }
 0x29b   : > { %s1072_s29 = smov %s1069_s12 }

// kernel: bottleneck1d_pallas.7
= control target key start
LH: loop header
LB: loop body
LE: loop exit
PB: predicated region body
PF: predicated region fallthrough
CT: control target
= control target key end

     0   :  { %s1366_s0 = inlined_call_operand.vmem [shape: bf16[2,8,512], index: 0, kind: input, shape index: {}]   ;;  %s1367_s1 = inlined_call_operand.vmem [shape: bf16[2,32,512], index: 1, kind: input, shape index: {}]   ;;  %s1368_s2 = inlined_call_operand.vmem [shape: f32[2,32,1], index: 2, kind: input, shape index: {}]   ;;  %s1369_s3 = inlined_call_operand.vmem [shape: f32[8,1], index: 3, kind: input, shape index: {}]   ;;  %s1370_s4 = inlined_call_operand.vmem [shape: f32[8,1], index: 4, kind: input, shape index: {}]   ;;  %s1371_s5 = inlined_call_operand.vmem [shape: bf16[32,8], index: 5, kind: input, shape index: {}]   ;;  %s1372_s6 = inlined_call_operand.vmem [shape: f32[32,1], index: 6, kind: input, shape index: {}]   ;;  %s1373_s7 = inlined_call_operand.vmem [shape: f32[32,1], index: 7, kind: input, shape index: {}]   ;;  %s1374_s8 = inlined_call_operand.vmem [shape: f32[32,1], index: 8, kind: input, shape index: {}]   ;;  %s1375_s9 = inlined_call_operand.vmem [shape: f32[32,1], index: 9, kind: input, shape index: {}]   ;;  %s1376_s10 = inlined_call_operand.hbm [shape: f32[2,32,512], index: 10, kind: output, shape index: {}]  }
   0x1   :  { %1381 = sst [smem:[#allocation10_spill]] %s1367_s1 }
   0x2   :  { %15 = vsyncpa [#allocation4], 0 }
   0x3   :  { %17 = vsyncpa [#allocation4 + $0x1], 0  ;;  %s1139_s13 = smov 0   ;;  %s1141_s14 = smov 0  }
   0x4   :  { %s1143_s15 = smov 0   ;;  %s1145_s16 = smov 0  }
   0x5   :  { %s1147_s17 = smov 0   ;;  %s1149_s18 = smov 0  }
   0x6   :  { %s1151_s19 = smov 0   ;;  %s1153_s20 = smov 0  }
   0x7 LB: > { %1382 = sst [smem:[#allocation6_spill]] %s1049_s13  ;;  %s861_s21 = sadd.s32 4294967295, %s1077_s20   ;;  %s1077_s20 = sphi %s1153_s20, %s23_s20   ;;  %s1073_s19 = sphi %s1151_s19, %s1400_s19   ;;  %s1069_s18 = sphi %s1149_s18, %s1399_s18   ;;  %s1065_s17 = sphi %s1147_s17, %s1398_s17   ;;  %s1061_s16 = sphi %s1145_s16, %s1397_s16   ;;  %s1057_s15 = sphi %s1143_s15, %s1396_s15   ;;  %s1053_s14 = sphi %s1141_s14, %s1395_s14   ;;  %s1049_s13 = sphi %s1139_s13, %s1394_s13  }
   0x8   : > { %s862_s22 = sadd.s32 4294967294, %s1077_s20   ;;  %s32_s23 = sadd.s32 1, %s1069_s18 }
   0x9   : > { %p33_p0 = scmp.ge.s32.totalorder %s32_s23, 4  ;;  %s35_s24 = sadd.s32 1, %s1073_s19 }
   0xa   : > { %p79_p1 = scmp.ne.s32.totalorder %s1057_s15, %s1053_s14  ;;  %p80_p2 = scmp.eq.s32.totalorder %s1077_s20, 0 }
   0xb   : > { %s1402_s23 = smov (%p33_p0, %s32_s23), 0  ;;  %s1404_s24 = smov (!%p33_p0, %s35_s24), %s1073_s19 }
   0xc   : > { %1383 = sst [smem:[#allocation7_spill]] %s1402_s23  ;;  %s68_s25 = ssub.s32 %s1069_s18, %s1402_s23 }
   0xd   : > { %p1191_p3 = por %p80_p2, %p79_p1  ;;  %p37_p4 = scmp.ge.s32.totalorder %s1404_s24, 2 }
   0xe   : > { %p284_p5 = scmp.eq.s32.totalorder %s861_s21, 7  ;;  %p289_p6 = scmp.ne.s32.totalorder %s1053_s14, %s1049_s13 }
   0xf   : > { %p290_p7 = scmp.eq.s32.totalorder %s862_s22, 7  ;;  %s1406_s24 = smov (%p37_p4, %s1404_s24), 0 }
  0x10   : > { %1385 = sst [smem:[#allocation8_spill]] %s1406_s24  ;;  %p1199_p8 = por %p284_p5, %p79_p1 }
  0x11   : > { %p1203_p9 = por %p290_p7, %p289_p6  ;;  %s67_s29 = ssub.s32 %s1073_s19, %s1406_s24 }
  0x12   : > { %s69_s30 = sor.u32 %s68_s25, %s67_s29  ;;  %s72_s11 = sadd.s32 1, %s1057_s15 }
  0x13   : > { %s1387_s28 = scalar_select %p1203_p9, 1, 0 }
  0x14   : > { %p70_p10 = scmp.eq.s32.totalorder %s69_s30, 0  ;;  %p864_p11 = scmp.ge.s32.totalorder %s1077_s20, 8 }
  0x15   : > { %1388 = sst [smem:[#allocation9_spill]] %s1387_s28 }
  0x16   : > { %s1211_s12 = scalar_select %p70_p10, %s1057_s15, %s72_s11  }
  0x17   : > { %327 = sbr.rel (%p864_p11) target bundleno = 43 (0x2b), region = 44 }
  0x1e   : > { %341 = sbr.rel (!%p1191_p3) target bundleno = 43 (0x2b), region = 52  ;;  %s343_s21 = sand.u32 (%p1191_p3), 1, %s1057_s15  }
  0x1f   : > { %s866_s22 = sshll.u32 (%p1191_p3), %s1073_s19, 4  ;;  %s865_s23 = sshll.u32 (%p1191_p3), %s343_s21, 4 }
  0x20   : > { %s347_s13 = sadd.s32 (%p1191_p3), %s1069_s18, %s866_s22  ;;  %s1389_s1 = sld [smem:[#allocation10_spill]] (%p1191_p3) }
  0x21   : > { %s867_s28 = sshll.u32 (%p1191_p3), %s347_s13, 2  ;;  %s345_s30 = scalar_lea.vmem (%p1191_p3), [#allocation2], %s865_s23 }
  0x26   : > { %s349_s29 = scalar_lea.vmem %s1389_s1, %s867_s28 }
  0x27   : > { %v365_v0 = vld [vmem:[%s349_s29] sm:$0xf]  ;;  %v367_v1 = vld [vmem:[%s349_s29 + $0x10] sm:$0xf] }
  0x28   : > { %v369_v2 = vld [vmem:[%s349_s29 + $0x20] sm:$0xf]  ;;  %366 = vst [vmem:[%s345_s30] sm:$0xf] %v365_v0  ;;  %368 = vst [vmem:[%s345_s30 + $0x4] sm:$0xf] %v367_v1 }
  0x29   : > { %370 = vst [vmem:[%s345_s30 + $0x8] sm:$0xf] %v369_v2  ;;  %v371_v3 = vld [vmem:[%s349_s29 + $0x30] sm:$0xf] }
  0x2a   : > { %372 = vst [vmem:[%s345_s30 + $0xc] sm:$0xf] %v371_v3 }
  0x2b PF: > { %p868_p12 = scmp.ge.s32.totalorder %s1077_s20, 1  ;;  %p410_p13 = scmp.lt.s32.totalorder %s1077_s20, 9 }
  0x2d   : > { %p411_p0 = pnand %p868_p12, %p410_p13 }
  0x2e   : > { %v483_v4 = vld [vmem:[%s1369_s3] sm:$0xff] (!%p411_p0)  ;;  %v1079_v5 = vmov (!%p411_p0), 0   ;;  %v575_v7 = vld [vmem:[%s1372_s6 + $0x10] sm:$0xff] (!%p411_p0)  ;;  %p467_p1 = scmp.lt.s32.totalorder (!%p411_p0), %s1065_s17, 1  ;;  %vm513_vm0 = vcmask (!%p411_p0), 64512   ;;  %v574_v15 = vld [vmem:[%s1372_s6 + $0x8] sm:$0xff] (!%p411_p0) }
  0x2f   : > { %414 = sbr.rel (%p411_p0) target bundleno = 431 (0x1af), region = 97  ;;  %979 = vset.pattern.permute.xlu0 (!%p411_p0), %v1079_v5  ;;  %980 = vset.pattern.permute.xlu1 (!%p411_p0), %v1079_v5  ;;  %v490_v6 = vld [vmem:[%s1370_s4] sm:$0xff] (!%p411_p0)  ;;  %v603_v10 = vld [vmem:[%s1373_s7 + $0x10] sm:$0xff] (!%p411_p0)  ;;  %v576_v17 = vld [vmem:[%s1372_s6 + $0x18] sm:$0xff] (!%p411_p0)  ;;  %p469_p2 = scmp.lt.s32.totalorder (!%p411_p0), %s1061_s16, 3  ;;  %vm520_vm1 = vcmask (!%p411_p0), 1043456  }
  0x30   : > { %486 = vperm.xlu0 (!%p411_p0), %979, %v483_v4   ;;  %v601_v8 = vld [vmem:[%s1373_s7] sm:$0xff] (!%p411_p0)  ;;  %v667_v12 = vld [vmem:[%s1374_s8 + $0x10] sm:$0xff] (!%p411_p0)  ;;  %v602_v19 = vld [vmem:[%s1373_s7 + $0x8] sm:$0xff] (!%p411_p0) }
  0x31   : > { %v981_v9 = vld [vmem:[%s1371_s5] sm:$0xff] (!%p411_p0)   ;;  %v695_v20 = vld [vmem:[%s1375_s9 + $0x10] sm:$0xff] (!%p411_p0)  ;;  %v604_v21 = vld [vmem:[%s1373_s7 + $0x18] sm:$0xff] (!%p411_p0) }
  0x32   : > { %899 = vmatprep.mubr.msk.bf16.mxu0 (!%p411_p0), %vm513_vm0, %v981_v9  ;;  %v665_v11 = vld [vmem:[%s1374_s8] sm:$0xff] (!%p411_p0)  ;;  %v666_v22 = vld [vmem:[%s1374_s8 + $0x8] sm:$0xff] (!%p411_p0)  ;;  %v668_v23 = vld [vmem:[%s1374_s8 + $0x18] sm:$0xff] (!%p411_p0) }
  0x33   : > { %v573_v13 = vld [vmem:[%s1372_s6] sm:$0xff] (!%p411_p0)  ;;  %v694_v26 = vld [vmem:[%s1375_s9 + $0x8] sm:$0xff] (!%p411_p0)  ;;  %v696_v27 = vld [vmem:[%s1375_s9 + $0x18] sm:$0xff] (!%p411_p0) }
  0x34   : > { %493 = vperm.xlu0 (!%p411_p0), %979, %v490_v6   ;;  %579 = vperm.xlu1 (!%p411_p0), %980, %v573_v13   ;;  %v693_v18 = vld [vmem:[%s1375_s9] sm:$0xff] (!%p411_p0)  ;;  %v982_v37 = vld [vmem:[%s1371_s5 + $0x8] sm:$0xff] (!%p411_p0)  }
  0x36   : > { %s1245_s24 = scalar_select %p467_p1, %s1065_s17, 1 }
  0x37   : > { %s470_s13 = scalar_select %p469_p2, %s1061_s16, 3 }
  0x38   : > { %589 = vperm.xlu0 %979, %v575_v7   ;;  %s884_s28 = sshll.u32 %s1245_s24, 5  ;;  %584 = vperm.xlu1 %980, %v574_v15   ;;  %s871_s23 = sshll.u32 %s1245_s24, 2 }
  0x39   : > { %s479_s29 = scalar_lea.vmem %s1368_s2, %s884_s28  ;;  %s472_s26 = sadd.s32 %s871_s23, %s470_s13 }
  0x3a   : > { %v629_v14 = vld [vmem:[%s479_s29] sm:$0xff]  ;;  %v631_v16 = vld [vmem:[%s479_s29 + $0x10] sm:$0xff]  ;;  %v630_v24 = vld [vmem:[%s479_s29 + $0x8] sm:$0xff]  ;;  %s872_s11 = sshll.u32 %s472_s26, 2  ;;  %s1301_s24 = sand.u32 1, %s1053_s14  }
  0x3b   : > { %v632_v25 = vld [vmem:[%s479_s29 + $0x18] sm:$0xff]  ;;  %s474_s29 = scalar_lea.vmem %s1366_s0, %s872_s11  ;;  %s869_s1 = sshll.u32 %s1301_s24, 4 }
  0x3c   : > { %607 = vperm.xlu0 %979, %v601_v8   ;;  %594 = vperm.xlu1 %980, %v576_v17   ;;  %v481_v28 = vld [vmem:[%s474_s29] sm:$0xf]  ;;  %s419_s30 = scalar_lea.vmem [#allocation2], %s869_s1  ;;  %s880_s13 = sshll.u32 %s1065_s17, 4 }
  0x3d   : > { %v482_v29 = vunpack.c.l.bf16 %v481_v28  ;;  %v893_v54 = vld [vmem:[%s419_s30 + $0x8] sm:$0xff]   ;;  %v886_v56 = vld [vmem:[%s419_s30] sm:$0xff]   ;;  %s870_s23 = sshll.u32 %s1301_s24, 5  ;;  %s745_s26 = sadd.s32 %s1061_s16, %s880_s13 }
  0x3e   : > { %v891_v58 = vunpack.c.l.bf16 %v893_v54  ;;  %v892_v59 = vunpack.c.h.bf16 %v893_v54  ;;  %v887_v60 = vunpack.c.l.bf16 %v886_v56  ;;  %v888_v61 = vunpack.c.h.bf16 %v886_v56  ;;  %s466_s11 = scalar_lea.vmem [#allocation3], %s870_s23  ;;  %s881_s28 = sshll.u32 %s745_s26, 7 }
  0x3f   : > { %s748_s17 = sshll.u32 %s466_s11, 4  ;;  %s1312_s29 = scalar_lea.hbm %s1376_s10, %s881_s28  ;;  %s1307_s17 = int_to_ptr.vmem [resolvable:$true] %s748_s17 }
  0x40   : > { %617 = vperm.xlu0 %979, %v603_v10   ;;  %612 = vperm.xlu1 %980, %v602_v19   ;;  %s734_s22 = scalar_lea.sflag [#allocation4], %s1301_s24  ;;  %s983_s25 = scalar_lea.vmem %s1307_s17, 512 }
  0x41   : > { %p984_p3 = scmp.ne.s32.totalorder %s1307_s17, %s983_s25  ;;  %s1080_s1 = smov [#allocation3]  }
  0x42   : > { %s987_s30 = sshll.u32 %s1080_s1, 4  ;;  %s988_s30 = int_to_ptr.vmem [resolvable:$false] %s987_s30 }
  0x43   : > { %p985_p4 = pnand %p984_p3, %p1199_p8  ;;  %s989_s13 = scalar_lea.vmem %s988_s30, 1024 }
  0x44   : > { %671 = vperm.xlu0 %979, %v665_v11   ;;  %622 = vperm.xlu1 %980, %v604_v21   ;;  %p990_p6 = scmp.lt.s32.totalorder %s1307_s17, %s988_s30  ;;  %p991_p7 = scmp.lt.s32.totalorder %s989_s13, %s983_s25 }
  0x45   : > { %p986_p5 = pneg %p985_p4 }
  0x46   : > { %p992_p10 = por %p991_p7, %p990_p6 }
  0x48   : > { %681 = vperm.xlu0 %979, %v667_v12   ;;  %676 = vperm.xlu1 %980, %v666_v22   ;;  %p993_p11 = pnand %p992_p10, %p986_p5 }
  0x4c   : > { %635 = vperm.xlu0 %979, %v629_v14   ;;  %686 = vperm.xlu1 %980, %v668_v23  }
  0x50   : > { %645 = vperm.xlu0 %979, %v631_v16   ;;  %640 = vperm.xlu1 %980, %v630_v24  }
  0x54   : > { %699 = vperm.xlu0 %979, %v693_v18   ;;  %650 = vperm.xlu1 %980, %v632_v25  }
  0x58   : > { %709 = vperm.xlu0 %979, %v695_v20   ;;  %704 = vperm.xlu1 %980, %v694_v26  }
  0x5c   : > { %714 = vperm.xlu1 %980, %v696_v27  }
  0xaf   : > { %v487_v30 = vpop.permute.xlu0 %486 }
  0xb0   : > { %v489_v31 = vmul.f32 %v487_v30, %v482_v29 }
  0xb3   : > { %v494_v32 = vpop.permute.xlu0 %493  ;;  %v580_v38 = vpop.permute.xlu1 %579 }
  0xb4   : > { %v496_v33 = vadd.f32 %v494_v32, %v489_v31 }
  0xb6   : > { %v497_v34 = vmax.f32 %v496_v33, 0.0 }
  0xb7   : > { %v585_v39 = vpop.permute.xlu1 %584  ;;  %v590_v40 = vpop.permute.xlu0 %589 }
  0xb8   : > { %v502_v35 = vpack.c.bf16 %v497_v34, %v497_v34 }
  0xba   : > { %903 = vmatprep.subr.msk.bf16.mxu0 %vm520_vm1, %v502_v35  ;;  %v522_v36 = vsel %vm520_vm1, %v502_v35, 0 }
  0xbb   : > { %898 = vmatpush3.bf16.msra.mxu0 %v522_v36  ;;  %v595_v41 = vpop.permute.xlu1 %594  ;;  %v608_v42 = vpop.permute.xlu0 %607 }
  0xbe   : > { %900 = vmatmul.mubr.msk.bf16.vlgmr.msra.gmra.mrb[0].mxu0 %vm513_vm0, %v982_v37 }
  0xbf   : > { %v613_v43 = vpop.permute.xlu1 %612  ;;  %v618_v44 = vpop.permute.xlu0 %617 }
  0xc3   : > { %v623_v45 = vpop.permute.xlu1 %622  ;;  %v672_v46 = vpop.permute.xlu0 %671 }
  0xc4   : > { %v689_v9 = vmul.f32 %v887_v60, %v672_v46 }
  0xc7   : > { %v677_v47 = vpop.permute.xlu1 %676  ;;  %v682_v48 = vpop.permute.xlu0 %681 }
  0xc8   : > { %v691_v4 = vmul.f32 %v891_v58, %v682_v48  ;;  %v690_v10 = vmul.f32 %v888_v61, %v677_v47 }
  0xcb   : > { %v687_v49 = vpop.permute.xlu1 %686  ;;  %v636_v50 = vpop.permute.xlu0 %635 }
  0xcc   : > { %v692_v5 = vmul.f32 %v892_v59, %v687_v49 }
  0xcf   : > { %v641_v51 = vpop.permute.xlu1 %640  ;;  %v646_v52 = vpop.permute.xlu0 %645 }
  0xd3   : > { %v651_v53 = vpop.permute.xlu1 %650  ;;  %v700_v55 = vpop.permute.xlu0 %699 }
  0xd4   : > { %v717_v17 = vadd.f32 %v700_v55, %v689_v9 }
  0xd7   : > { %v705_v57 = vpop.permute.xlu1 %704  ;;  %v710_v1 = vpop.permute.xlu0 %709 }
  0xd8   : > { %v719_v14 = vadd.f32 %v710_v1, %v691_v4  ;;  %v718_v23 = vadd.f32 %v705_v57, %v690_v10 }
  0xdb   : > { %v715_v11 = vpop.permute.xlu1 %714 }
  0xdc   : > { %v720_v20 = vadd.f32 %v715_v11, %v692_v5 }
 0x191   : > { %v901_v62 = vpop.f32.mrb[0].mxu0 }
 0x192   : > { %v599_v63 = vmul.f32 %v901_v62, %v590_v40  ;;  %v558_v0 = vpop.f32.mrb[1].mxu0 }
 0x193   : > { %v597_v2 = vmul.f32 %v580_v38, %v558_v0  ;;  %v902_v3 = vpop.f32.mrb[2].mxu0 }
 0x194   : > { %v627_v6 = vadd.f32 %v618_v44, %v599_v63  ;;  %v600_v7 = vmul.f32 %v902_v3, %v595_v41  ;;  %v561_v8 = vpop.f32.mrb[3].mxu0 }
 0x195   : > { %v625_v12 = vadd.f32 %v608_v42, %v597_v2  ;;  %v598_v13 = vmul.f32 %v585_v39, %v561_v8 }
 0x196   : > { %v655_v15 = vmul.f32 %v646_v52, %v627_v6  ;;  %v628_v16 = vadd.f32 %v623_v45, %v600_v7 }
 0x197   : > { %v653_v18 = vmul.f32 %v636_v50, %v625_v12  ;;  %v626_v19 = vadd.f32 %v613_v43, %v598_v13 }
 0x198   : > { %v723_v21 = vadd.f32 %v719_v14, %v655_v15  ;;  %v656_v22 = vmul.f32 %v651_v53, %v628_v16 }
 0x199   : > { %v721_v24 = vadd.f32 %v717_v17, %v653_v18  ;;  %v654_v25 = vmul.f32 %v641_v51, %v626_v19 }
 0x19a   : > { %v727_v26 = vmax.f32 %v723_v21, 0.0  ;;  %v724_v27 = vadd.f32 %v720_v20, %v656_v22 }
 0x19b   : > { %v725_v28 = vmax.f32 %v721_v24, 0.0  ;;  %v722_v29 = vadd.f32 %v718_v23, %v654_v25 }
 0x19c   : > { %731 = vst [vmem:[%s466_s11 + $0x10] sm:$0xff] %v727_v26  ;;  %v728_v30 = vmax.f32 %v724_v27, 0.0 }
 0x19d   : > { %729 = vst [vmem:[%s466_s11] sm:$0xff] %v725_v28  ;;  %v726_v31 = vmax.f32 %v722_v29, 0.0 }
 0x19e   : > { %732 = vst [vmem:[%s466_s11 + $0x18] sm:$0xff] %v728_v30 }
 0x19f   : > { %730 = vst [vmem:[%s466_s11 + $0x8] sm:$0xff] %v726_v31 }
 0x1a0   : > { %996 = shalt.err (!%p993_p11)
}
 0x1a1   : > { %s997_s23 = scalar_lea.hbm %s1312_s29, 512  ;;  %s1001_s28 = scalar_lea.hbm %s1376_s10, 4096 }
 0x1a2   : > { %p998_p12 = scmp.ne.s32.totalorder %s1312_s29, %s997_s23  ;;  %p1002_p1 = scmp.lt.u32.totalorder %s1312_s29, %s1376_s10 }
 0x1a3   : > { %p1003_p2 = scmp.lt.u32.totalorder %s1001_s28, %s997_s23  ;;  %p1005_p4 = scmp.lt.u32.totalorder %s997_s23, %s1312_s29 }
 0x1a4   : > { %p999_p13 = pnand %p998_p12, %p1199_p8 }
 0x1a5   : > { %p1004_p3 = por %p1003_p2, %p1002_p1 }
 0x1a6   : > { %p1000_p0 = pneg %p999_p13 }
 0x1a7   : > { %p1006_p5 = por %p1005_p4, %p1004_p3 }
 0x1a9   : > { %p1007_p6 = pnand %p1006_p5, %p1000_p0 }
 0x1ab   : > { %1010 = shalt.err (!%p1007_p6)
}
 0x1ac   : > { %s1081_s25 = smov 128   ;;  %s1082_s1 = smov 512  }
 0x1ad   : > { %s1083_s30 = smov 8  }
 0x1ae   : > { %904 = dma.vmem_to_hbm [thread:$0]  (%p1199_p8), %s1307_s17, 512, %s1312_s29, %s734_s22, %s1081_s25, %s1082_s1, %s1083_s30  }
 0x1af PF: > { %s1390_s13 = sld [smem:[#allocation6_spill]]  ;;  %p910_p7 = scmp.ge.s32.totalorder %s1077_s20, 2 }
 0x1b1   : > { %p907_p10 = pnand %p910_p7, %p1203_p9 }
 0x1b5   : > { %s763_s11 = sand.u32 1, %s1390_s13  }
 0x1b6   : > { %s764_s23 = scalar_lea.sflag [#allocation4], %s763_s11 }
 0x1b7   : > { %1044 = dma.done.wait (!%p907_p10), %s764_s23, 512  }
 0x1b8   : > { %1046 = vsyncadd (!%p907_p10), %s764_s23, 4294966784  ;;  %s23_s20 = sadd.s32 1, %s1077_s20   ;;  %s1392_s27 = sld [smem:[#allocation7_spill]] }
 0x1b9   : > { %p20_p11 = scmp.ge.s32.totalorder %s23_s20, 10   ;;  %s1393_s24 = sld [smem:[#allocation8_spill]] }
 0x1ba   : > { %s1394_s13 = smov %s1053_s14  ;;  %s1395_s14 = smov %s1057_s15 }
 0x1bb   : > { %s1396_s15 = smov %s1211_s12  ;;  %s1397_s16 = smov %s1069_s18 }
 0x1bc   : > { %s1398_s17 = smov %s1073_s19  ;;  %22 = sbr.rel (!%p20_p11) target bundleno = 7 (0x7), region = 147 }
 0x1be   : > { %s1399_s18 = smov %s1392_s27 }
 0x1bf   : > { %s1400_s19 = smov %s1393_s24 }
 0x1c3   :  { %769 = vsyncpa [#allocation4], 1 }
 0x1c4   :  { %771 = vsyncpa [#allocation4 + $0x1], 1 }

</bundles_post_ra>
